<compile_context>
chip_gen: v5e
topology: v5e:2x2
jax: 0.10.0
libtpu: 0.0.40
codegen_flags: <defaults>
</compile_context>

<pallas_src>
import functools

import jax
import jax.numpy as jnp
from jax.experimental import pallas as pl
from jax.experimental.pallas import tpu as pltpu

LANES = 128  # TPU lane width; PACK = LANES // hidden tokens share one output row


# ----------------------------- Pallas kernel --------------------------------
def _tower_kernel(x_ref, wc_ref, bc_ref, w2_ref, b2_ref, o_ref):
    # fused (patch-embed ∘ fc1), token-packed: bf16 operands, f32 MXU accumulation
    h = jnp.dot(x_ref[...], wc_ref[...], preferred_element_type=jnp.float32)
    # bias + tanh-GELU in f32 (VPU adds + EUP transcendental)
    h = jax.nn.gelu(h + bc_ref[...], approximate=True)
    # fc2 (block-diagonal, exactly 128 output lanes -> unmasked full-lane store)
    tok = jnp.dot(h.astype(w2_ref.dtype), w2_ref[...],
                  preferred_element_type=jnp.float32)
    o_ref[...] = (tok + b2_ref[...]).astype(o_ref.dtype)


def _tower_matmul(x2d, wc, bc, w2, b2, *, tmp):
    """x2d: (Mp, Kp) token-packed rows.  Returns (Mp, 128) f32, lane-dense."""
    Mp, Kp = x2d.shape
    H1p = wc.shape[1]
    HP = w2.shape[1]
    assert Mp % tmp == 0  # tmp is chosen from divisors of Mp in the wrapper

    const = lambda i: (0, 0)
    flops = 2 * Mp * Kp * H1p + 2 * Mp * H1p * HP
    bytes_accessed = (Mp * Kp * 2 + Kp * H1p * 2 + H1p * HP * 2
                      + (H1p + HP) * 4 + Mp * HP * 4)
    return pl.pallas_call(
        _tower_kernel,
        out_shape=jax.ShapeDtypeStruct((Mp, HP), jnp.float32),
        grid_spec=pltpu.PrefetchScalarGridSpec(
            num_scalar_prefetch=0,
            grid=(Mp // tmp,),
            in_specs=[
                pl.BlockSpec((tmp, Kp), lambda i: (i, 0)),  # packed token rows
                pl.BlockSpec((Kp, H1p), const),             # block-diag patch+fc1 W
                pl.BlockSpec((1, H1p), const),              # tiled folded bias
                pl.BlockSpec((H1p, HP), const),             # block-diag fc2 weight
                pl.BlockSpec((1, HP), const),               # tiled fc2 bias
            ],
            out_specs=pl.BlockSpec((tmp, HP), lambda i: (i, 0)),
        ),
        compiler_params=pltpu.CompilerParams(
            dimension_semantics=("parallel",)),
        cost_estimate=pl.CostEstimate(flops=flops,
                                      transcendentals=Mp * H1p,
                                      bytes_accessed=bytes_accessed),
    )(x2d, wc, bc, w2, b2)


# ------------------------------ glue / wrapper -------------------------------
def _im2col_3d(x, patch):
    """x: (B, C, D, H, W) NCDHW -> (B * nTok, C*pd*ph*pw), token order D',H',W'."""
    B, C, D, H, W = x.shape
    pd, ph, pw = patch
    Dp, Hp, Wp = D // pd, H // ph, W // pw
    x = x.reshape(B, C, Dp, pd, Hp, ph, Wp, pw)
    x = x.transpose(0, 2, 4, 6, 1, 3, 5, 7)          # B, D', H', W', C, pd, ph, pw
    return x.reshape(B * Dp * Hp * Wp, C * pd * ph * pw), (Dp, Hp, Wp)


def _pick_tm(M):
    """Tokens per grid step: largest divisor of M in {1024,512,256,128} with >=2 steps."""
    for tm in (1024, 512, 256, 128):
        if M % tm == 0 and M // tm >= 2:
            return tm
    return M  # degenerate fallback (not reached for M = B*256)


@functools.partial(jax.jit, static_argnames=("patch", "hidden"))
def _forward(pixel_values, wc_blk, bc_blk, w2_blk, b2_blk, *, patch, hidden):
    B = pixel_values.shape[0]
    pack = LANES // hidden
    # bf16 BEFORE the im2col transpose: halves the repack copy's HBM traffic.
    x2d, (Dp, Hp, Wp) = _im2col_3d(pixel_values.astype(jnp.bfloat16), patch)
    n_tok = Dp * Hp * Wp
    assert n_tok == 256, f"encoder must yield 256 tokens, got {n_tok}"

    M, K = x2d.shape
    tm = _pick_tm(M)                                  # tokens per grid step
    x2d = x2d.reshape(M // pack, pack * K)            # pack tokens (free view)

    tok = _tower_matmul(x2d, wc_blk, bc_blk, w2_blk, b2_blk, tmp=tm // pack)
    return tok.reshape(B, n_tok, hidden)              # free view: no slice, no pad


def _block_diag(w, reps):
    k, n = w.shape
    out = jnp.zeros((reps * k, reps * n), w.dtype)
    for g in range(reps):
        out = out.at[g * k:(g + 1) * k, g * n:(g + 1) * n].set(w)
    return out


class CTVisionTowerPallas:
    """Synthetic CTVisionTower: conv3d patch encoder + MLP projector, fused on TPU."""

    def __init__(self, key, in_ch=4, patch=(2, 4, 4), embed=64, mlp=128, hidden=32):
        assert LANES % hidden == 0, "token packing requires hidden | 128"
        self.patch = patch
        self.hidden_size = hidden
        self.pack = LANES // hidden
        k = in_ch * patch[0] * patch[1] * patch[2]
        ks = jax.random.split(key, 6)
        s = lambda fan_in: 1.0 / jnp.sqrt(jnp.float32(fan_in))
        # ct_encoder: Conv3d(in_ch, embed, kernel=patch, stride=patch)
        self.wp = jax.random.normal(ks[0], (k, embed), jnp.float32) * s(k)
        self.bp = jax.random.normal(ks[1], (1, embed), jnp.float32) * 0.01
        # projector: Linear(embed, mlp) -> GELU -> Linear(mlp, hidden)
        self.w1 = jax.random.normal(ks[2], (embed, mlp), jnp.float32) * s(embed)
        self.b1 = jax.random.normal(ks[3], (1, mlp), jnp.float32) * 0.01
        self.w2 = jax.random.normal(ks[4], (mlp, hidden), jnp.float32) * s(mlp)
        self.b2 = jax.random.normal(ks[5], (1, hidden), jnp.float32) * 0.01

        # Fold patch-embed into fc1 offline (no nonlinearity in between -> exact up
        # to fp reassociation), then build PACK-way block-diagonal / lane-tiled
        # copies so PACK tokens occupy one 128-lane row all the way to the store.
        w_comb = self.wp @ self.w1                         # (k, mlp)
        b_comb = self.bp @ self.w1 + self.b1               # (1, mlp)
        self.w_comb, self.b_comb = w_comb, b_comb          # kept for the reference
        self.wc_blk = _block_diag(w_comb, self.pack).astype(jnp.bfloat16)
        self.bc_blk = jnp.tile(b_comb, (1, self.pack))                  # f32
        self.w2_blk = _block_diag(self.w2, self.pack).astype(jnp.bfloat16)
        self.b2_blk = jnp.tile(self.b2, (1, self.pack))                 # f32

    def __call__(self, pixel_values):
        """pixel_values: (B, C, D, H, W) -> last_hidden_state (B, 256, hidden)."""
        return _forward(pixel_values, self.wc_blk, self.bc_blk,
                        self.w2_blk, self.b2_blk,
                        patch=self.patch, hidden=self.hidden_size)


# ----------------------------- reference (JAX) -------------------------------
def _reference(tower, pixel_values):
    """Same math (folded weights, bf16 operands, f32 accumulation) in plain JAX."""
    x2d, _ = _im2col_3d(pixel_values.astype(jnp.bfloat16), tower.patch)
    wc_bf = tower.w_comb.astype(jnp.bfloat16)
    w2_bf = tower.w2.astype(jnp.bfloat16)
    h = jnp.dot(x2d, wc_bf, preferred_element_type=jnp.float32) + tower.b_comb
    h = jax.nn.gelu(h, approximate=True)
    tok = jnp.dot(h.astype(jnp.bfloat16), w2_bf,
                  preferred_element_type=jnp.float32) + tower.b2
    B = pixel_values.shape[0]
    return tok.reshape(B, 256, tower.hidden_size)


if __name__ == "__main__":
    key = jax.random.PRNGKey(0)
    k_param, k_x = jax.random.split(key)

    B, C, D, H, W = 2, 4, 8, 32, 32            # (B, C, D, H, W) CT volume, NCDHW
    pixel_values = jax.random.normal(k_x, (B, C, D, H, W), jnp.float32)

    tower = CTVisionTowerPallas(k_param, in_ch=C, patch=(2, 4, 4),
                                embed=64, mlp=128, hidden=32)

    out = tower(pixel_values)
    out = jax.block_until_ready(out)
    assert out.shape == (B, 256, 32), out.shape

    ref = _reference(tower, pixel_values)
    assert jnp.allclose(out, ref, atol=1e-2, rtol=1e-2), \
        float(jnp.max(jnp.abs(out - ref)))

    print("KERNEL_OK")
</pallas_src>

<mosaic_0001>
module attributes {stable_mosaic.version = 11 : i64} {
  func.func @_tower_kernel(%arg0: i32, %arg1: memref<64x512xbf16, #tpu.memory_space<vmem>>, %arg2: memref<512x512xbf16, #tpu.memory_space<vmem>>, %arg3: memref<1x512xf32, #tpu.memory_space<vmem>>, %arg4: memref<512x128xbf16, #tpu.memory_space<vmem>>, %arg5: memref<1x128xf32, #tpu.memory_space<vmem>>, %arg6: memref<64x128xf32, #tpu.memory_space<vmem>>) attributes {dimension_semantics = [#tpu.dimension_semantics<parallel>], iteration_bounds = array<i64: 2>, scalar_prefetch = 0 : i64, scratch_operands = 0 : i64, tpu.core_type = #tpu.core_type<tc>, window_params = [{transform_indices = @transform_0, window_bounds = array<i64: 64, 512>}, {pipeline_mode = #tpu.pipeline_mode<synchronous>, transform_indices = @transform_1, window_bounds = array<i64: 512, 512>}, {pipeline_mode = #tpu.pipeline_mode<synchronous>, transform_indices = @transform_2, window_bounds = array<i64: 1, 512>}, {pipeline_mode = #tpu.pipeline_mode<synchronous>, transform_indices = @transform_3, window_bounds = array<i64: 512, 128>}, {pipeline_mode = #tpu.pipeline_mode<synchronous>, transform_indices = @transform_4, window_bounds = array<i64: 1, 128>}, {transform_indices = @transform_5, window_bounds = array<i64: 64, 128>}]} {
    %c0 = arith.constant 0 : index
    %c0_0 = arith.constant 0 : index
    %0 = vector.load %arg1[%c0, %c0_0] : memref<64x512xbf16, #tpu.memory_space<vmem>>, vector<64x512xbf16>
    %c0_1 = arith.constant 0 : index
    %c0_2 = arith.constant 0 : index
    %1 = vector.load %arg2[%c0_1, %c0_2] : memref<512x512xbf16, #tpu.memory_space<vmem>>, vector<512x512xbf16>
    %cst = arith.constant dense<0.000000e+00> : vector<64x512xf32>
    %2 = tpu.matmul %0, %1, %cst {dimension_numbers = #tpu.dot_dimension_numbers<[1], [0], [0], [1], [0, 0, 1, 1], [], []>} : vector<64x512xbf16>, vector<512x512xbf16>, vector<64x512xf32> -> vector<64x512xf32>
    %c0_3 = arith.constant 0 : index
    %c0_4 = arith.constant 0 : index
    %3 = vector.load %arg3[%c0_3, %c0_4] : memref<1x512xf32, #tpu.memory_space<vmem>>, vector<1x512xf32>
    %4 = vector.broadcast %3 : vector<1x512xf32> to vector<64x512xf32>
    %5 = arith.addf %2, %4 : vector<64x512xf32>
    %6 = arith.mulf %5, %5 : vector<64x512xf32>
    %7 = arith.mulf %5, %6 : vector<64x512xf32>
    %cst_5 = arith.constant 4.471500e-02 : f32
    %8 = vector.broadcast %cst_5 : f32 to vector<64x512xf32>
    %9 = arith.mulf %8, %7 : vector<64x512xf32>
    %10 = arith.addf %5, %9 : vector<64x512xf32>
    %cst_6 = arith.constant 0.797884583 : f32
    %11 = vector.broadcast %cst_6 : f32 to vector<64x512xf32>
    %12 = arith.mulf %11, %10 : vector<64x512xf32>
    %13 = math.tanh %12 : vector<64x512xf32>
    %cst_7 = arith.constant 1.000000e+00 : f32
    %14 = vector.broadcast %cst_7 : f32 to vector<64x512xf32>
    %15 = arith.addf %14, %13 : vector<64x512xf32>
    %cst_8 = arith.constant 5.000000e-01 : f32
    %16 = vector.broadcast %cst_8 : f32 to vector<64x512xf32>
    %17 = arith.mulf %16, %15 : vector<64x512xf32>
    %18 = arith.mulf %5, %17 : vector<64x512xf32>
    %19 = arith.truncf %18 : vector<64x512xf32> to vector<64x512xbf16>
    %c0_9 = arith.constant 0 : index
    %c0_10 = arith.constant 0 : index
    %20 = vector.load %arg4[%c0_9, %c0_10] : memref<512x128xbf16, #tpu.memory_space<vmem>>, vector<512x128xbf16>
    %cst_11 = arith.constant dense<0.000000e+00> : vector<64x128xf32>
    %21 = tpu.matmul %19, %20, %cst_11 {dimension_numbers = #tpu.dot_dimension_numbers<[1], [0], [0], [1], [0, 0, 1, 1], [], []>} : vector<64x512xbf16>, vector<512x128xbf16>, vector<64x128xf32> -> vector<64x128xf32>
    %c0_12 = arith.constant 0 : index
    %c0_13 = arith.constant 0 : index
    %22 = vector.load %arg5[%c0_12, %c0_13] : memref<1x128xf32, #tpu.memory_space<vmem>>, vector<1x128xf32>
    %23 = vector.broadcast %22 : vector<1x128xf32> to vector<64x128xf32>
    %24 = arith.addf %21, %23 : vector<64x128xf32>
    %c0_14 = arith.constant 0 : index
    %c0_15 = arith.constant 0 : index
    %25 = vector.load %arg6[%c0_14, %c0_15] : memref<64x128xf32, #tpu.memory_space<vmem>>, vector<64x128xf32>
    tpu.vector_store %arg6[%c0_14, %c0_15], %24 {strides = array<i32>} : memref<64x128xf32, #tpu.memory_space<vmem>>, vector<64x128xf32>,
    return
  }
  func.func @transform_0(%arg0: i32) -> (i32, i32) {
    %c0_i32 = arith.constant 0 : i32
    %c0_i32_0 = arith.constant 0 : i32
    return %arg0, %c0_i32 : i32, i32
  }
  func.func @transform_1(%arg0: i32) -> (i32, i32) {
    %c0_i32 = arith.constant 0 : i32
    %c0_i32_0 = arith.constant 0 : i32
    %c0_i32_1 = arith.constant 0 : i32
    return %c0_i32, %c0_i32_0 : i32, i32
  }
  func.func @transform_2(%arg0: i32) -> (i32, i32) {
    %c0_i32 = arith.constant 0 : i32
    %c0_i32_0 = arith.constant 0 : i32
    %c0_i32_1 = arith.constant 0 : i32
    return %c0_i32, %c0_i32_0 : i32, i32
  }
  func.func @transform_3(%arg0: i32) -> (i32, i32) {
    %c0_i32 = arith.constant 0 : i32
    %c0_i32_0 = arith.constant 0 : i32
    %c0_i32_1 = arith.constant 0 : i32
    return %c0_i32, %c0_i32_0 : i32, i32
  }
  func.func @transform_4(%arg0: i32) -> (i32, i32) {
    %c0_i32 = arith.constant 0 : i32
    %c0_i32_0 = arith.constant 0 : i32
    %c0_i32_1 = arith.constant 0 : i32
    return %c0_i32, %c0_i32_0 : i32, i32
  }
  func.func @transform_5(%arg0: i32) -> (i32, i32) {
    %c0_i32 = arith.constant 0 : i32
    %c0_i32_0 = arith.constant 0 : i32
    return %arg0, %c0_i32 : i32, i32
  }
}

</mosaic_0001>

<bundles_post_ra>
// kernel: _forward.1
= control target key start
LH: loop header
LB: loop body
LE: loop exit
PB: predicated region body
PF: predicated region fallthrough
CT: control target
= control target key end

     0   :  { %s3318_s18 = smov 0   ;;  %s4617_s0 = inlined_call_operand.vmem [shape: bf16[128,512], index: 0, kind: input, shape index: {}]   ;;  %s4618_s1 = inlined_call_operand.vmem [shape: bf16[512,512], index: 1, kind: input, shape index: {}]   ;;  %s4619_s2 = inlined_call_operand.vmem [shape: f32[1,512], index: 2, kind: input, shape index: {}]   ;;  %s4620_s3 = inlined_call_operand.vmem [shape: bf16[512,128], index: 3, kind: input, shape index: {}]   ;;  %s4621_s4 = inlined_call_operand.vmem [shape: f32[1,128], index: 4, kind: input, shape index: {}]   ;;  %s4622_s5 = inlined_call_operand.vmem [shape: f32[128,128], index: 5, kind: output, shape index: {}]  }
   0x1 LB: > { %s2313_s19 = sadd.s32 4294967295, %s3286_s18   ;;  %p2317_p0 = scmp.ge.s32.totalorder %s3286_s18, 1  ;;  %s3286_s18 = sphi %s3318_s18, %s15_s18  }
   0x2   : > { %p189_p1 = scmp.lt.s32.totalorder %s3286_s18, 3 }
   0x4   : > { %p190_p2 = pnand %p2317_p0, %p189_p1 }
   0x5   : > { %s2318_s11 = sshll.u32 (!%p190_p2), %s2313_s19, 3 }
   0x6   : > { %193 = sbr.rel (%p190_p2) target bundleno = 599 (0x257), region = 40  ;;  %p219_p3 = scmp.lt.s32.totalorder (!%p190_p2), %s2318_s11, 15 }
   0xb   : > { %v2501_v0 = vld [vmem:[%s4618_s1 + $0xe0] sm:$0xf]  ;;  %v3076_v1 = vld [vmem:[%s4618_s1 + $0xec] sm:$0xf0]  ;;  %s4624_s11 = smov (!%p219_p3, %s2318_s11), 15 }
   0xc   : > { %v2629_v2 = vld [vmem:[%s4618_s1 + $0x1e0] sm:$0xf]  ;;  %v2502_v3 = vor.u32 %v3076_v1, %v2501_v0  ;;  %v3108_v4 = vld [vmem:[%s4618_s1 + $0x1ec] sm:$0xf0]  ;;  %s3029_s8 = sshll.u32 %s4624_s11, 4  ;;  %s2322_s13 = sshll.u32 %s4624_s11, 3 }
   0xd   : > { %v2757_v5 = vld [vmem:[%s4618_s1 + $0x2e0] sm:$0xf]  ;;  %v3140_v6 = vld [vmem:[%s4618_s1 + $0x2ec] sm:$0xf0]  ;;  %v2630_v7 = vor.u32 %v3108_v4, %v2629_v2  ;;  %s3532_s16 = scalar_lea.vmem %s4617_s0, %s3029_s8  ;;  %s4604_s17 = scalar_lea.vmem %s4622_s5, %s2322_s13 }
   0xe   : > { %v2758_v8 = vor.u32 %v3140_v6, %v2757_v5  ;;  %v2885_v9 = vld [vmem:[%s4618_s1 + $0x3e0] sm:$0xf]  ;;  %v3172_v10 = vld [vmem:[%s4618_s1 + $0x3ec] sm:$0xf0]  ;;  %1105 = vmatpush.bf16.msra.mxu0 %v2502_v3 }
   0xf   : > { %v2485_v11 = vld [vmem:[%s4618_s1 + $0xc0] sm:$0xf]  ;;  %v2886_v12 = vor.u32 %v3172_v10, %v2885_v9  ;;  %v3072_v13 = vld [vmem:[%s4618_s1 + $0xcc] sm:$0xf0]  ;;  %1134 = vmatpush.bf16.msra.mxu1 %v2630_v7 }
  0x10   : > { %v2613_v14 = vld [vmem:[%s4618_s1 + $0x1c0] sm:$0xf]  ;;  %v3104_v15 = vld [vmem:[%s4618_s1 + $0x1cc] sm:$0xf0]  ;;  %1163 = vmatpush.bf16.msra.mxu2 %v2758_v8  ;;  %v2486_v16 = vor.u32 %v3072_v13, %v2485_v11 }
  0x11   : > { %v2614_v17 = vor.u32 %v3104_v15, %v2613_v14  ;;  %v2741_v18 = vld [vmem:[%s4618_s1 + $0x2c0] sm:$0xf]  ;;  %v3136_v19 = vld [vmem:[%s4618_s1 + $0x2cc] sm:$0xf0]  ;;  %1192 = vmatpush.bf16.msra.mxu3 %v2886_v12 }
  0x12   : > { %v2869_v20 = vld [vmem:[%s4618_s1 + $0x3c0] sm:$0xf]  ;;  %v2742_v21 = vor.u32 %v3136_v19, %v2741_v18  ;;  %v3168_v22 = vld [vmem:[%s4618_s1 + $0x3cc] sm:$0xf0]  ;;  %1106 = vmatpush.bf16.msra.mxu0 %v2486_v16 }
  0x13   : > { %v2469_v23 = vld [vmem:[%s4618_s1 + $0xa0] sm:$0xf]  ;;  %v3068_v24 = vld [vmem:[%s4618_s1 + $0xac] sm:$0xf0]  ;;  %v2870_v25 = vor.u32 %v3168_v22, %v2869_v20  ;;  %1135 = vmatpush.bf16.msra.mxu1 %v2614_v17 }
  0x14   : > { %v2597_v26 = vld [vmem:[%s4618_s1 + $0x1a0] sm:$0xf]  ;;  %v3100_v27 = vld [vmem:[%s4618_s1 + $0x1ac] sm:$0xf0]  ;;  %v2470_v29 = vor.u32 %v3068_v24, %v2469_v23  ;;  %1164 = vmatpush.bf16.msra.mxu2 %v2742_v21 }
  0x15   : > { %v2725_v28 = vld [vmem:[%s4618_s1 + $0x2a0] sm:$0xf]  ;;  %v3132_v30 = vld [vmem:[%s4618_s1 + $0x2ac] sm:$0xf0]  ;;  %v2598_v33 = vor.u32 %v3100_v27, %v2597_v26  ;;  %1193 = vmatpush.bf16.msra.mxu3 %v2870_v25 }
  0x16   : > { %v2853_v31 = vld [vmem:[%s4618_s1 + $0x3a0] sm:$0xf]  ;;  %v3164_v32 = vld [vmem:[%s4618_s1 + $0x3ac] sm:$0xf0]  ;;  %v2726_v34 = vor.u32 %v3132_v30, %v2725_v28  ;;  %1107 = vmatpush.bf16.msra.mxu0 %v2470_v29  ;;  %v3138_v28 = vld [vmem:[%s4618_s1 + $0x2e4] sm:$0xf] }
  0x17   : > { %v2453_v35 = vld [vmem:[%s4618_s1 + $0x80] sm:$0xf]  ;;  %v3064_v36 = vld [vmem:[%s4618_s1 + $0x8c] sm:$0xf0]  ;;  %v2854_v38 = vor.u32 %v3164_v32, %v2853_v31  ;;  %1136 = vmatpush.bf16.msra.mxu1 %v2598_v33  ;;  %v2759_v29 = vld [vmem:[%s4618_s1 + $0x2f0] sm:$0xf0] }
  0x18   : > { %v2581_v37 = vld [vmem:[%s4618_s1 + $0x180] sm:$0xf]  ;;  %v3096_v39 = vld [vmem:[%s4618_s1 + $0x18c] sm:$0xf0]  ;;  %v2454_v44 = vor.u32 %v3064_v36, %v2453_v35  ;;  %1165 = vmatpush.bf16.msra.mxu2 %v2726_v34  ;;  %v3074_v31 = vld [vmem:[%s4618_s1 + $0xe4] sm:$0xf] }
  0x19   : > { %v2709_v40 = vld [vmem:[%s4618_s1 + $0x280] sm:$0xf]  ;;  %v3128_v41 = vld [vmem:[%s4618_s1 + $0x28c] sm:$0xf0]  ;;  %v2582_v45 = vor.u32 %v3096_v39, %v2581_v37  ;;  %1194 = vmatpush.bf16.msra.mxu3 %v2854_v38  ;;  %v2503_v32 = vld [vmem:[%s4618_s1 + $0xf0] sm:$0xf0] }
  0x1a   : > { %v2837_v42 = vld [vmem:[%s4618_s1 + $0x380] sm:$0xf]  ;;  %v3160_v43 = vld [vmem:[%s4618_s1 + $0x38c] sm:$0xf0]  ;;  %v2710_v46 = vor.u32 %v3128_v41, %v2709_v40  ;;  %1108 = vmatpush.bf16.msra.mxu0 %v2454_v44  ;;  %v3170_v33 = vld [vmem:[%s4618_s1 + $0x3e4] sm:$0xf] }
  0x1b   : > { %v2437_v47 = vld [vmem:[%s4618_s1 + $0x60] sm:$0xf]  ;;  %v3060_v48 = vld [vmem:[%s4618_s1 + $0x6c] sm:$0xf0]  ;;  %v2838_v50 = vor.u32 %v3160_v43, %v2837_v42  ;;  %1137 = vmatpush.bf16.msra.mxu1 %v2582_v45  ;;  %v2887_v34 = vld [vmem:[%s4618_s1 + $0x3f0] sm:$0xf0] }
  0x1c   : > { %v2565_v49 = vld [vmem:[%s4618_s1 + $0x160] sm:$0xf]  ;;  %v3092_v51 = vld [vmem:[%s4618_s1 + $0x16c] sm:$0xf0]  ;;  %v2438_v56 = vor.u32 %v3060_v48, %v2437_v47  ;;  %1166 = vmatpush.bf16.msra.mxu2 %v2710_v46  ;;  %v3030_v39 = vld [vmem:[%s3532_s16 + $0x4] sm:$0xf]  ;;  %v2762_v47 = vor.u32 %v3138_v28, %v2759_v29 }
  0x1d   : > { %v2693_v52 = vld [vmem:[%s4618_s1 + $0x260] sm:$0xf]  ;;  %v3124_v53 = vld [vmem:[%s4618_s1 + $0x26c] sm:$0xf0]  ;;  %v2566_v57 = vor.u32 %v3092_v51, %v2565_v49  ;;  %1195 = vmatpush.bf16.msra.mxu3 %v2838_v50  ;;  %v3106_v40 = vld [vmem:[%s4618_s1 + $0x1e4] sm:$0xf]  ;;  %v2890_v51 = vor.u32 %v3170_v33, %v2887_v34 }
  0x1e   : > { %v2821_v54 = vld [vmem:[%s4618_s1 + $0x360] sm:$0xf]  ;;  %v3156_v55 = vld [vmem:[%s4618_s1 + $0x36c] sm:$0xf0]  ;;  %v2694_v58 = vor.u32 %v3124_v53, %v2693_v52  ;;  %1109 = vmatpush.bf16.msra.mxu0 %v2438_v56  ;;  %v2631_v41 = vld [vmem:[%s4618_s1 + $0x1f0] sm:$0xf0] }
  0x1f   : > { %v2421_v59 = vld [vmem:[%s4618_s1 + $0x40] sm:$0xf]  ;;  %v3056_v60 = vld [vmem:[%s4618_s1 + $0x4c] sm:$0xf0]  ;;  %v2822_v62 = vor.u32 %v3156_v55, %v2821_v54  ;;  %1138 = vmatpush.bf16.msra.mxu1 %v2566_v57  ;;  %v3134_v42 = vld [vmem:[%s4618_s1 + $0x2c4] sm:$0xf] }
  0x20   : > { %v2549_v61 = vld [vmem:[%s4618_s1 + $0x140] sm:$0xf]  ;;  %v3088_v63 = vld [vmem:[%s4618_s1 + $0x14c] sm:$0xf0]  ;;  %v2422_v4 = vor.u32 %v3056_v60, %v2421_v59  ;;  %1167 = vmatpush.bf16.msra.mxu2 %v2694_v58  ;;  %v2327_v44 = vld [vmem:[%s3532_s16 + $0x10] sm:$0xf0]  ;;  %v2506_v58 = vor.u32 %v3074_v31, %v2503_v32  ;;  %v2634_v59 = vor.u32 %v3106_v40, %v2631_v41 }
  0x21   : > { %v2677_v0 = vld [vmem:[%s4618_s1 + $0x240] sm:$0xf]  ;;  %v3120_v1 = vld [vmem:[%s4618_s1 + $0x24c] sm:$0xf0]  ;;  %v2550_v6 = vor.u32 %v3088_v63, %v2549_v61  ;;  %1196 = vmatpush.bf16.msra.mxu3 %v2822_v62  ;;  %v2333_v45 = vld [vmem:[%s3532_s16 + $0x8] sm:$0xf]  ;;  %v3568_v53 = vor.u32 %v3030_v39, %v2327_v44 }
  0x22   : > { %v2805_v2 = vld [vmem:[%s4618_s1 + $0x340] sm:$0xf]  ;;  %v3152_v3 = vld [vmem:[%s4618_s1 + $0x34c] sm:$0xf0]  ;;  %v2678_v7 = vor.u32 %v3120_v1, %v2677_v0  ;;  %1110 = vmatpush.bf16.msra.mxu0 %v2422_v4  ;;  %v3033_v46 = vld [vmem:[%s3532_s16 + $0x14] sm:$0xf0] }
  0x23   : > { %v2405_v5 = vld [vmem:[%s4618_s1 + $0x20] sm:$0xf]  ;;  %v3052_v8 = vld [vmem:[%s4618_s1 + $0x2c] sm:$0xf0]  ;;  %v2806_v11 = vor.u32 %v3152_v3, %v2805_v2  ;;  %1139 = vmatpush.bf16.msra.mxu1 %v2550_v6  ;;  %v3031_v49 = vld [vmem:[%s3532_s16 + $0xc] sm:$0xf]  ;;  %v3570_v54 = vor.u32 %v3033_v46, %v2333_v45 }
  0x24   : > { %v2533_v9 = vld [vmem:[%s4618_s1 + $0x120] sm:$0xf]  ;;  %v3084_v10 = vld [vmem:[%s4618_s1 + $0x12c] sm:$0xf0]  ;;  %v2406_v16 = vor.u32 %v3052_v8, %v2405_v5  ;;  %1168 = vmatpush.bf16.msra.mxu2 %v2678_v7  ;;  %v2335_v50 = vld [vmem:[%s3532_s16 + $0x18] sm:$0xf0] }
  0x25   : > { %v2661_v12 = vld [vmem:[%s4618_s1 + $0x220] sm:$0xf]  ;;  %v3116_v13 = vld [vmem:[%s4618_s1 + $0x22c] sm:$0xf0]  ;;  %v2534_v20 = vor.u32 %v3084_v10, %v2533_v9  ;;  %1197 = vmatpush.bf16.msra.mxu3 %v2806_v11  ;;  %v2743_v52 = vld [vmem:[%s4618_s1 + $0x2d0] sm:$0xf0]  ;;  %v3578_v57 = vor.u32 %v3031_v49, %v2335_v50 }
  0x26   : > { %v2789_v14 = vld [vmem:[%s4618_s1 + $0x320] sm:$0xf]  ;;  %v3148_v15 = vld [vmem:[%s4618_s1 + $0x32c] sm:$0xf0]  ;;  %v2662_v21 = vor.u32 %v3116_v13, %v2661_v12  ;;  %1111 = vmatpush.bf16.msra.mxu0 %v2406_v16  ;;  %v3166_v55 = vld [vmem:[%s4618_s1 + $0x3c4] sm:$0xf]  ;;  %v2746_v60 = vor.u32 %v3134_v42, %v2743_v52 }
  0x27   : > { %v2389_v17 = vld [vmem:[%s4618_s1] sm:$0xf]  ;;  %v3048_v18 = vld [vmem:[%s4618_s1 + $0xc] sm:$0xf0]  ;;  %v2790_v24 = vor.u32 %v3148_v15, %v2789_v14  ;;  %1140 = vmatpush.bf16.msra.mxu1 %v2534_v20  ;;  %v2871_v56 = vld [vmem:[%s4618_s1 + $0x3d0] sm:$0xf0] }
  0x28   : > { %v2517_v19 = vld [vmem:[%s4618_s1 + $0x100] sm:$0xf]  ;;  %v3080_v22 = vld [vmem:[%s4618_s1 + $0x10c] sm:$0xf0]  ;;  %v2390_v30 = vor.u32 %v3048_v18, %v2389_v17  ;;  %1169 = vmatpush.bf16.msra.mxu2 %v2662_v21  ;;  %v3070_v61 = vld [vmem:[%s4618_s1 + $0xc4] sm:$0xf]  ;;  %v2874_v0 = vor.u32 %v3166_v55, %v2871_v56 }
  0x29   : > { %v2645_v23 = vld [vmem:[%s4618_s1 + $0x200] sm:$0xf]  ;;  %v3112_v25 = vld [vmem:[%s4618_s1 + $0x20c] sm:$0xf0]  ;;  %v2518_v35 = vor.u32 %v3080_v22, %v2517_v19  ;;  %1198 = vmatpush.bf16.msra.mxu3 %v2790_v24  ;;  %v2487_v62 = vld [vmem:[%s4618_s1 + $0xd0] sm:$0xf0] }
  0x2a   : > { %v2773_v26 = vld [vmem:[%s4618_s1 + $0x300] sm:$0xf]  ;;  %v3144_v27 = vld [vmem:[%s4618_s1 + $0x30c] sm:$0xf0]  ;;  %v2646_v36 = vor.u32 %v3112_v25, %v2645_v23  ;;  %1112 = vmatpush.bf16.msra.mxu0 %v2390_v30  ;;  %v3102_v63 = vld [vmem:[%s4618_s1 + $0x1c4] sm:$0xf]  ;;  %v2490_v6 = vor.u32 %v3070_v61, %v2487_v62 }
  0x2b   : > { %v2325_v37 = vld [vmem:[%s3532_s16] sm:$0xf]  ;;  %v3032_v38 = vld [vmem:[%s3532_s16 + $0xc] sm:$0xf0]  ;;  %v2774_v43 = vor.u32 %v3144_v27, %v2773_v26  ;;  %1141 = vmatpush.bf16.msra.mxu1 %v2518_v35  ;;  %v2615_v1 = vld [vmem:[%s4618_s1 + $0x1d0] sm:$0xf0] }
  0x2c   : > { %v3561_v48 = vor.u32 %v3032_v38, %v2325_v37  ;;  %1170 = vmatpush.bf16.msra.mxu2 %v2646_v36  ;;  %v3130_v2 = vld [vmem:[%s4618_s1 + $0x2a4] sm:$0xf]  ;;  %v2727_v3 = vld [vmem:[%s4618_s1 + $0x2b0] sm:$0xf0]  ;;  %v2618_v7 = vor.u32 %v3102_v63, %v2615_v1  ;;  %v2341_v19 = vld [vmem:[%s3532_s16 + $0x20] sm:$0xf] }
  0x2d   : > { %1199 = vmatpush.bf16.msra.mxu3 %v2774_v43  ;;  %v3162_v4 = vld [vmem:[%s4618_s1 + $0x3a4] sm:$0xf]  ;;  %v2855_v5 = vld [vmem:[%s4618_s1 + $0x3b0] sm:$0xf0]  ;;  %v2730_v8 = vor.u32 %v3130_v2, %v2727_v3  ;;  %v3036_v20 = vld [vmem:[%s3532_s16 + $0x2c] sm:$0xf0] }
  0x2e   : > { %1113 = vmatmul.bf16.vlgmr.msra.gmra.mxu0 %v3561_v48  ;;  %1142 = vmatmul.bf16.vlgmr.msra.gmra.mxu1 %v3568_v53  ;;  %v3066_v9 = vld [vmem:[%s4618_s1 + $0xa4] sm:$0xf]  ;;  %v2471_v10 = vld [vmem:[%s4618_s1 + $0xb0] sm:$0xf0]  ;;  %v2858_v12 = vor.u32 %v3162_v4, %v2855_v5  ;;  %v2349_v32 = vld [vmem:[%s3532_s16 + $0x28] sm:$0xf]  ;;  %v3673_v44 = vor.u32 %v3036_v20, %v2341_v19 }
  0x2f   : > { %1171 = vmatmul.bf16.vlgmr.msra.gmra.mxu2 %v3570_v54  ;;  %1221 = vmatpush.bf16.msrb.mxu0 %v2506_v58  ;;  %v3098_v11 = vld [vmem:[%s4618_s1 + $0x1a4] sm:$0xf]  ;;  %v2599_v13 = vld [vmem:[%s4618_s1 + $0x1b0] sm:$0xf0]  ;;  %v2474_v18 = vor.u32 %v3066_v9, %v2471_v10  ;;  %v3037_v35 = vld [vmem:[%s3532_s16 + $0x34] sm:$0xf0] }
  0x30   : > { %1279 = vmatpush.bf16.msrb.mxu2 %v2762_v47  ;;  %1200 = vmatmul.bf16.vlgmr.msra.gmra.mxu3 %v3578_v57  ;;  %v3126_v14 = vld [vmem:[%s4618_s1 + $0x284] sm:$0xf]  ;;  %v2711_v15 = vld [vmem:[%s4618_s1 + $0x290] sm:$0xf0]  ;;  %v2602_v21 = vor.u32 %v3098_v11, %v2599_v13  ;;  %v3035_v36 = vld [vmem:[%s3532_s16 + $0x2c] sm:$0xf] }
  0x31   : > { %1308 = vmatpush.bf16.msrb.mxu3 %v2890_v51  ;;  %1250 = vmatpush.bf16.msrb.mxu1 %v2634_v59  ;;  %v3158_v16 = vld [vmem:[%s4618_s1 + $0x384] sm:$0xf]  ;;  %v2839_v17 = vld [vmem:[%s4618_s1 + $0x390] sm:$0xf0]  ;;  %v2714_v22 = vor.u32 %v3126_v14, %v2711_v15  ;;  %v2351_v37 = vld [vmem:[%s3532_s16 + $0x38] sm:$0xf0]  ;;  %v3686_v51 = vor.u32 %v3037_v35, %v2349_v32 }
  0x32   : > { %v3062_v23 = vld [vmem:[%s4618_s1 + $0x84] sm:$0xf]  ;;  %v2455_v24 = vld [vmem:[%s4618_s1 + $0x90] sm:$0xf0]  ;;  %v2842_v28 = vor.u32 %v3158_v16, %v2839_v17  ;;  %v3694_v56 = vor.u32 %v3035_v36, %v2351_v37 }
  0x33   : > { %1222 = vmatpush.bf16.msrb.mxu0 %v2490_v6  ;;  %v3094_v25 = vld [vmem:[%s4618_s1 + $0x184] sm:$0xf]  ;;  %v2343_v27 = vld [vmem:[%s3532_s16 + $0x30] sm:$0xf0]  ;;  %v2458_v38 = vor.u32 %v3062_v23, %v2455_v24 }
  0x34   : > { %1280 = vmatpush.bf16.msrb.mxu2 %v2746_v60  ;;  %v3034_v26 = vld [vmem:[%s3532_s16 + $0x24] sm:$0xf]  ;;  %v2583_v29 = vld [vmem:[%s4618_s1 + $0x190] sm:$0xf0] }
  0x35   : > { %1309 = vmatpush.bf16.msrb.mxu3 %v2874_v0  ;;  %1251 = vmatpush.bf16.msrb.mxu1 %v2618_v7  ;;  %v3122_v30 = vld [vmem:[%s4618_s1 + $0x264] sm:$0xf]  ;;  %v2695_v31 = vld [vmem:[%s4618_s1 + $0x270] sm:$0xf0]  ;;  %v2586_v39 = vor.u32 %v3094_v25, %v2583_v29  ;;  %v3684_v50 = vor.u32 %v3034_v26, %v2343_v27  ;;  %v2357_v26 = vld [vmem:[%s3532_s16 + $0x40] sm:$0xf] }
  0x36   : > { %v3154_v33 = vld [vmem:[%s4618_s1 + $0x364] sm:$0xf]  ;;  %v2823_v34 = vld [vmem:[%s4618_s1 + $0x370] sm:$0xf0]  ;;  %v2698_v40 = vor.u32 %v3122_v30, %v2695_v31  ;;  %v3040_v27 = vld [vmem:[%s3532_s16 + $0x4c] sm:$0xf0] }
  0x37   : > { %1223 = vmatpush.bf16.msrb.mxu0 %v2474_v18  ;;  %v3058_v41 = vld [vmem:[%s4618_s1 + $0x64] sm:$0xf]  ;;  %v2439_v42 = vld [vmem:[%s4618_s1 + $0x70] sm:$0xf0]  ;;  %v2826_v45 = vor.u32 %v3154_v33, %v2823_v34  ;;  %v2365_v30 = vld [vmem:[%s3532_s16 + $0x48] sm:$0xf]  ;;  %v3768_v36 = vor.u32 %v3040_v27, %v2357_v26 }
  0x38   : > { %1281 = vmatpush.bf16.msrb.mxu2 %v2730_v8  ;;  %v3090_v43 = vld [vmem:[%s4618_s1 + $0x164] sm:$0xf]  ;;  %v2567_v46 = vld [vmem:[%s4618_s1 + $0x170] sm:$0xf0]  ;;  %v2442_v58 = vor.u32 %v3058_v41, %v2439_v42  ;;  %v3041_v31 = vld [vmem:[%s3532_s16 + $0x54] sm:$0xf0] }
  0x39   : > { %1310 = vmatpush.bf16.msrb.mxu3 %v2858_v12  ;;  %1252 = vmatpush.bf16.msrb.mxu1 %v2602_v21  ;;  %v3118_v47 = vld [vmem:[%s4618_s1 + $0x244] sm:$0xf]  ;;  %v2679_v49 = vld [vmem:[%s4618_s1 + $0x250] sm:$0xf0]  ;;  %v2570_v59 = vor.u32 %v3090_v43, %v2567_v46  ;;  %v3039_v33 = vld [vmem:[%s3532_s16 + $0x4c] sm:$0xf] }
  0x3a   : > { %v3150_v52 = vld [vmem:[%s4618_s1 + $0x344] sm:$0xf]  ;;  %v2807_v55 = vld [vmem:[%s4618_s1 + $0x350] sm:$0xf0]  ;;  %v2682_v60 = vor.u32 %v3118_v47, %v2679_v49  ;;  %v2367_v34 = vld [vmem:[%s3532_s16 + $0x58] sm:$0xf0] }
  0x3b   : > { %1224 = vmatpush.bf16.msrb.mxu0 %v2458_v38  ;;  %v3054_v61 = vld [vmem:[%s4618_s1 + $0x44] sm:$0xf]  ;;  %v2423_v62 = vld [vmem:[%s4618_s1 + $0x50] sm:$0xf0]  ;;  %v2810_v63 = vor.u32 %v3150_v52, %v2807_v55  ;;  %v3772_v38 = vor.u32 %v3041_v31, %v2365_v30  ;;  %v3141_v41 = vld [vmem:[%s4618_s1 + $0x2f4] sm:$0xf0] }
  0x3c   : > { %1282 = vmatpush.bf16.msrb.mxu2 %v2714_v22  ;;  %v3086_v0 = vld [vmem:[%s4618_s1 + $0x144] sm:$0xf]  ;;  %v2551_v1 = vld [vmem:[%s4618_s1 + $0x150] sm:$0xf0]  ;;  %v2426_v2 = vor.u32 %v3054_v61, %v2423_v62  ;;  %v2509_v42 = vld [vmem:[%s4618_s1 + $0xe8] sm:$0xf] }
  0x3d   : > { %1311 = vmatpush.bf16.msrb.mxu3 %v2842_v28  ;;  %1253 = vmatpush.bf16.msrb.mxu1 %v2586_v39  ;;  %v3114_v3 = vld [vmem:[%s4618_s1 + $0x224] sm:$0xf]  ;;  %v2663_v4 = vld [vmem:[%s4618_s1 + $0x230] sm:$0xf0]  ;;  %v2554_v6 = vor.u32 %v3086_v0, %v2551_v1  ;;  %v3774_v39 = vor.u32 %v3039_v33, %v2367_v34  ;;  %v2893_v46 = vld [vmem:[%s4618_s1 + $0x3e8] sm:$0xf] }
  0x3e   : > { %1118 = vmatmul.bf16.gmra.mxu0 %v3673_v44  ;;  %1147 = vmatmul.bf16.gmra.mxu1 %v3684_v50  ;;  %v3050_v5 = vld [vmem:[%s4618_s1 + $0x24] sm:$0xf]  ;;  %v2666_v7 = vor.u32 %v3114_v3, %v2663_v4  ;;  %v2407_v8 = vld [vmem:[%s4618_s1 + $0x30] sm:$0xf0]  ;;  %v3173_v47 = vld [vmem:[%s4618_s1 + $0x3f4] sm:$0xf0] }
  0x3f   : > { %1176 = vmatmul.bf16.gmra.mxu2 %v3686_v51  ;;  %1225 = vmatpush.bf16.msrb.mxu0 %v2442_v58  ;;  %v3146_v9 = vld [vmem:[%s4618_s1 + $0x324] sm:$0xf]  ;;  %v2791_v10 = vld [vmem:[%s4618_s1 + $0x330] sm:$0xf0]  ;;  %v2410_v16 = vor.u32 %v3050_v5, %v2407_v8  ;;  %v2894_v52 = vor.u32 %v3173_v47, %v2893_v46  ;;  %v2637_v55 = vld [vmem:[%s4618_s1 + $0x1e8] sm:$0xf] }
  0x40   : > { %1283 = vmatpush.bf16.msrb.mxu2 %v2698_v40  ;;  %1205 = vmatmul.bf16.gmra.mxu3 %v3694_v56  ;;  %v2794_v11 = vor.u32 %v3146_v9, %v2791_v10  ;;  %v3082_v12 = vld [vmem:[%s4618_s1 + $0x124] sm:$0xf]  ;;  %v2535_v13 = vld [vmem:[%s4618_s1 + $0x130] sm:$0xf0]  ;;  %v2765_v40 = vld [vmem:[%s4618_s1 + $0x2e8] sm:$0xf] }
  0x41   : > { %1312 = vmatpush.bf16.msrb.mxu3 %v2826_v45  ;;  %1254 = vmatpush.bf16.msrb.mxu1 %v2570_v59  ;;  %v3110_v14 = vld [vmem:[%s4618_s1 + $0x204] sm:$0xf]  ;;  %v2647_v15 = vld [vmem:[%s4618_s1 + $0x210] sm:$0xf0]  ;;  %v2538_v19 = vor.u32 %v3082_v12, %v2535_v13  ;;  %v2766_v43 = vor.u32 %v3141_v41, %v2765_v40  ;;  %v3077_v45 = vld [vmem:[%s4618_s1 + $0xf4] sm:$0xf0] }
  0x42   : > { %v3142_v17 = vld [vmem:[%s4618_s1 + $0x304] sm:$0xf]  ;;  %v2775_v18 = vld [vmem:[%s4618_s1 + $0x310] sm:$0xf0]  ;;  %v2650_v20 = vor.u32 %v3110_v14, %v2647_v15  ;;  %v2510_v49 = vor.u32 %v3077_v45, %v2509_v42  ;;  %v3109_v58 = vld [vmem:[%s4618_s1 + $0x1f4] sm:$0xf0] }
  0x43   : > { %1226 = vmatpush.bf16.msrb.mxu0 %v2426_v2  ;;  %v3046_v21 = vld [vmem:[%s4618_s1 + $0x4] sm:$0xf]  ;;  %v2391_v22 = vld [vmem:[%s4618_s1 + $0x10] sm:$0xf0]  ;;  %v2778_v23 = vor.u32 %v3142_v17, %v2775_v18  ;;  %v2749_v59 = vld [vmem:[%s4618_s1 + $0x2c8] sm:$0xf] }
  0x44   : > { %1284 = vmatpush.bf16.msrb.mxu2 %v2682_v60  ;;  %v3078_v24 = vld [vmem:[%s4618_s1 + $0x104] sm:$0xf]  ;;  %v2519_v25 = vld [vmem:[%s4618_s1 + $0x110] sm:$0xf0]  ;;  %v2394_v32 = vor.u32 %v3046_v21, %v2391_v22  ;;  %v2638_v60 = vor.u32 %v3109_v58, %v2637_v55  ;;  %v3137_v61 = vld [vmem:[%s4618_s1 + $0x2d4] sm:$0xf0] }
  0x45   : > { %1313 = vmatpush.bf16.msrb.mxu3 %v2810_v63  ;;  %1255 = vmatpush.bf16.msrb.mxu1 %v2554_v6  ;;  %v3038_v28 = vld [vmem:[%s3532_s16 + $0x44] sm:$0xf]  ;;  %v2359_v29 = vld [vmem:[%s3532_s16 + $0x50] sm:$0xf0]  ;;  %v2522_v35 = vor.u32 %v3078_v24, %v2519_v25  ;;  %v2493_v62 = vld [vmem:[%s4618_s1 + $0xc8] sm:$0xf]  ;;  %v2750_v0 = vor.u32 %v3137_v61, %v2749_v59 }
  0x46   : > { %v3770_v37 = vor.u32 %v3038_v28, %v2359_v29  ;;  %v3073_v63 = vld [vmem:[%s4618_s1 + $0xd4] sm:$0xf0]  ;;  %v2877_v2 = vld [vmem:[%s4618_s1 + $0x3c8] sm:$0xf]  ;;  %v2373_v8 = vld [vmem:[%s3532_s16 + $0x60] sm:$0xf] }
  0x47   : > { %1227 = vmatpush.bf16.msrb.mxu0 %v2410_v16  ;;  %v2494_v1 = vor.u32 %v3073_v63, %v2493_v62  ;;  %v3169_v3 = vld [vmem:[%s4618_s1 + $0x3d4] sm:$0xf0]  ;;  %v2621_v4 = vld [vmem:[%s4618_s1 + $0x1c8] sm:$0xf]  ;;  %v3044_v9 = vld [vmem:[%s3532_s16 + $0x6c] sm:$0xf0] }
  0x48   : > { %1285 = vmatpush.bf16.msrb.mxu2 %v2666_v7  ;;  %v2878_v5 = vor.u32 %v3169_v3, %v2877_v2  ;;  %v3105_v6 = vld [vmem:[%s4618_s1 + $0x1d4] sm:$0xf0]  ;;  %v3042_v10 = vld [vmem:[%s3532_s16 + $0x64] sm:$0xf]  ;;  %v2381_v12 = vld [vmem:[%s3532_s16 + $0x68] sm:$0xf]  ;;  %v3836_v16 = vor.u32 %v3044_v9, %v2373_v8 }
  0x49   : > { %1314 = vmatpush.bf16.msrb.mxu3 %v2794_v11  ;;  %1256 = vmatpush.bf16.msrb.mxu1 %v2538_v19  ;;  %v2622_v7 = vor.u32 %v3105_v6, %v2621_v4  ;;  %v2375_v11 = vld [vmem:[%s3532_s16 + $0x70] sm:$0xf0]  ;;  %v3045_v13 = vld [vmem:[%s3532_s16 + $0x74] sm:$0xf0]  ;;  %v3043_v14 = vld [vmem:[%s3532_s16 + $0x6c] sm:$0xf] }
  0x4a   : > { %v2383_v15 = vld [vmem:[%s3532_s16 + $0x78] sm:$0xf0]  ;;  %v3838_v17 = vor.u32 %v3042_v10, %v2375_v11  ;;  %v3840_v18 = vor.u32 %v3045_v13, %v2381_v12  ;;  %v3133_v21 = vld [vmem:[%s4618_s1 + $0x2b4] sm:$0xf0]  ;;  %v2477_v22 = vld [vmem:[%s4618_s1 + $0xa8] sm:$0xf] }
  0x4b   : > { %1228 = vmatpush.bf16.msrb.mxu0 %v2394_v32  ;;  %v3842_v19 = vor.u32 %v3043_v14, %v2383_v15  ;;  %v3069_v24 = vld [vmem:[%s4618_s1 + $0xb4] sm:$0xf0]  ;;  %v2861_v25 = vld [vmem:[%s4618_s1 + $0x3a8] sm:$0xf] }
  0x4c   : > { %1286 = vmatpush.bf16.msrb.mxu2 %v2650_v20  ;;  %v2733_v20 = vld [vmem:[%s4618_s1 + $0x2a8] sm:$0xf]  ;;  %v3165_v26 = vld [vmem:[%s4618_s1 + $0x3b4] sm:$0xf0]  ;;  %v2478_v27 = vor.u32 %v3069_v24, %v2477_v22 }
  0x4d   : > { %1315 = vmatpush.bf16.msrb.mxu3 %v2778_v23  ;;  %1257 = vmatpush.bf16.msrb.mxu1 %v2522_v35  ;;  %v2734_v23 = vor.u32 %v3133_v21, %v2733_v20  ;;  %v2862_v28 = vor.u32 %v3165_v26, %v2861_v25  ;;  %v2605_v29 = vld [vmem:[%s4618_s1 + $0x1a8] sm:$0xf]  ;;  %v3101_v30 = vld [vmem:[%s4618_s1 + $0x1b4] sm:$0xf0] }
  0x4e   : > { %1123 = vmatmul.bf16.gmra.mxu0 %v3768_v36  ;;  %1152 = vmatmul.bf16.gmra.mxu1 %v3770_v37  ;;  %v2717_v31 = vld [vmem:[%s4618_s1 + $0x288] sm:$0xf]  ;;  %v2606_v32 = vor.u32 %v3101_v30, %v2605_v29  ;;  %v3129_v33 = vld [vmem:[%s4618_s1 + $0x294] sm:$0xf0] }
  0x4f   : > { %1181 = vmatmul.bf16.gmra.mxu2 %v3772_v38  ;;  %1337 = vmatpush.bf16.msra.mxu0 %v2510_v49  ;;  %v2461_v34 = vld [vmem:[%s4618_s1 + $0x88] sm:$0xf]  ;;  %v3065_v35 = vld [vmem:[%s4618_s1 + $0x94] sm:$0xf0]  ;;  %v2718_v40 = vor.u32 %v3129_v33, %v2717_v31 }
  0x50   : > { %1210 = vmatmul.bf16.gmra.mxu3 %v3774_v39  ;;  %1395 = vmatpush.bf16.msra.mxu2 %v2766_v43  ;;  %v2462_v41 = vor.u32 %v3065_v35, %v2461_v34  ;;  %v2845_v42 = vld [vmem:[%s4618_s1 + $0x388] sm:$0xf]  ;;  %v3161_v43 = vld [vmem:[%s4618_s1 + $0x394] sm:$0xf0] }
  0x51   : > { %1424 = vmatpush.bf16.msra.mxu3 %v2894_v52  ;;  %1366 = vmatpush.bf16.msra.mxu1 %v2638_v60  ;;  %v2589_v45 = vld [vmem:[%s4618_s1 + $0x188] sm:$0xf]  ;;  %v2846_v46 = vor.u32 %v3161_v43, %v2845_v42  ;;  %v3097_v47 = vld [vmem:[%s4618_s1 + $0x194] sm:$0xf0] }
  0x52   : > { %v2590_v49 = vor.u32 %v3097_v47, %v2589_v45  ;;  %v2701_v52 = vld [vmem:[%s4618_s1 + $0x268] sm:$0xf]  ;;  %v3125_v55 = vld [vmem:[%s4618_s1 + $0x274] sm:$0xf0] }
  0x53   : > { %1338 = vmatpush.bf16.msra.mxu0 %v2494_v1  ;;  %v2445_v58 = vld [vmem:[%s4618_s1 + $0x68] sm:$0xf]  ;;  %v2702_v59 = vor.u32 %v3125_v55, %v2701_v52  ;;  %v3061_v60 = vld [vmem:[%s4618_s1 + $0x74] sm:$0xf0]  ;;  %v3139_v52 = vld [vmem:[%s4618_s1 + $0x2ec] sm:$0xf] }
  0x54   : > { %1396 = vmatpush.bf16.msra.mxu2 %v2750_v0  ;;  %v2829_v61 = vld [vmem:[%s4618_s1 + $0x368] sm:$0xf]  ;;  %v3157_v62 = vld [vmem:[%s4618_s1 + $0x374] sm:$0xf0]  ;;  %v2446_v63 = vor.u32 %v3061_v60, %v2445_v58  ;;  %v2767_v55 = vld [vmem:[%s4618_s1 + $0x2f8] sm:$0xf0] }
  0x55   : > { %1425 = vmatpush.bf16.msra.mxu3 %v2878_v5  ;;  %1367 = vmatpush.bf16.msra.mxu1 %v2622_v7  ;;  %v2830_v0 = vor.u32 %v3157_v62, %v2829_v61  ;;  %v2573_v1 = vld [vmem:[%s4618_s1 + $0x168] sm:$0xf]  ;;  %v3093_v2 = vld [vmem:[%s4618_s1 + $0x174] sm:$0xf0]  ;;  %v3075_v58 = vld [vmem:[%s4618_s1 + $0xec] sm:$0xf] }
  0x56   : > { %v2685_v3 = vld [vmem:[%s4618_s1 + $0x248] sm:$0xf]  ;;  %v2574_v4 = vor.u32 %v3093_v2, %v2573_v1  ;;  %v3121_v5 = vld [vmem:[%s4618_s1 + $0x254] sm:$0xf0]  ;;  %v2511_v60 = vld [vmem:[%s4618_s1 + $0xf8] sm:$0xf0] }
  0x57   : > { %1339 = vmatpush.bf16.msra.mxu0 %v2478_v27  ;;  %v2429_v6 = vld [vmem:[%s4618_s1 + $0x48] sm:$0xf]  ;;  %v3057_v7 = vld [vmem:[%s4618_s1 + $0x54] sm:$0xf0]  ;;  %v2686_v8 = vor.u32 %v3121_v5, %v2685_v3  ;;  %v3171_v61 = vld [vmem:[%s4618_s1 + $0x3ec] sm:$0xf] }
  0x58   : > { %1397 = vmatpush.bf16.msra.mxu2 %v2734_v23  ;;  %v2430_v9 = vor.u32 %v3057_v7, %v2429_v6  ;;  %v2813_v10 = vld [vmem:[%s4618_s1 + $0x348] sm:$0xf]  ;;  %v3153_v11 = vld [vmem:[%s4618_s1 + $0x354] sm:$0xf0]  ;;  %v2895_v62 = vld [vmem:[%s4618_s1 + $0x3f8] sm:$0xf0] }
  0x59   : > { %1426 = vmatpush.bf16.msra.mxu3 %v2862_v28  ;;  %1368 = vmatpush.bf16.msra.mxu1 %v2606_v32  ;;  %v2557_v12 = vld [vmem:[%s4618_s1 + $0x148] sm:$0xf]  ;;  %v2814_v13 = vor.u32 %v3153_v11, %v2813_v10  ;;  %v3089_v14 = vld [vmem:[%s4618_s1 + $0x154] sm:$0xf0]  ;;  %v4029_v1 = vld [vmem:[%s4619_s2] sm:$0xf] }
  0x5a   : > { %v2558_v15 = vor.u32 %v3089_v14, %v2557_v12  ;;  %v2669_v20 = vld [vmem:[%s4618_s1 + $0x228] sm:$0xf]  ;;  %v3117_v21 = vld [vmem:[%s4618_s1 + $0x234] sm:$0xf0]  ;;  %v4032_v2 = vperm.slane %v4029_v1, 0 }
  0x5b   : > { %1340 = vmatpush.bf16.msra.mxu0 %v2462_v41  ;;  %v2413_v22 = vld [vmem:[%s4618_s1 + $0x28] sm:$0xf]  ;;  %v2670_v23 = vor.u32 %v3117_v21, %v2669_v20  ;;  %v3053_v24 = vld [vmem:[%s4618_s1 + $0x34] sm:$0xf0]  ;;  %v3107_v6 = vld [vmem:[%s4618_s1 + $0x1ec] sm:$0xf] }
  0x5c   : > { %1398 = vmatpush.bf16.msra.mxu2 %v2718_v40  ;;  %v2797_v25 = vld [vmem:[%s4618_s1 + $0x328] sm:$0xf]  ;;  %v3149_v26 = vld [vmem:[%s4618_s1 + $0x334] sm:$0xf0]  ;;  %v2414_v27 = vor.u32 %v3053_v24, %v2413_v22  ;;  %v2639_v7 = vld [vmem:[%s4618_s1 + $0x1f8] sm:$0xf0] }
  0x5d   : > { %1427 = vmatpush.bf16.msra.mxu3 %v2846_v46  ;;  %1369 = vmatpush.bf16.msra.mxu1 %v2590_v49  ;;  %v2798_v28 = vor.u32 %v3149_v26, %v2797_v25  ;;  %v2541_v29 = vld [vmem:[%s4618_s1 + $0x128] sm:$0xf]  ;;  %v3085_v30 = vld [vmem:[%s4618_s1 + $0x134] sm:$0xf0]  ;;  %v2751_v10 = vld [vmem:[%s4618_s1 + $0x2d8] sm:$0xf0] }
  0x5e   : > { %1128 = vmatmul.bf16.gmra.mxu0 %v3836_v16  ;;  %1157 = vmatmul.bf16.gmra.mxu1 %v3838_v17  ;;  %v2653_v31 = vld [vmem:[%s4618_s1 + $0x208] sm:$0xf]  ;;  %v2542_v32 = vor.u32 %v3085_v30, %v2541_v29  ;;  %v3113_v33 = vld [vmem:[%s4618_s1 + $0x214] sm:$0xf0]  ;;  %v3071_v11 = vld [vmem:[%s4618_s1 + $0xcc] sm:$0xf] }
  0x5f   : > { %1186 = vmatmul.bf16.gmra.mxu2 %v3840_v18  ;;  %1341 = vmatpush.bf16.msra.mxu0 %v2446_v63  ;;  %v2397_v34 = vld [vmem:[%s4618_s1 + $0x8] sm:$0xf]  ;;  %v3049_v35 = vld [vmem:[%s4618_s1 + $0x14] sm:$0xf0]  ;;  %v2654_v40 = vor.u32 %v3113_v33, %v2653_v31  ;;  %v2514_v63 = vor.u32 %v3075_v58, %v2511_v60  ;;  %v2495_v12 = vld [vmem:[%s4618_s1 + $0xd8] sm:$0xf0] }
  0x60   : > { %1215 = vmatmul.bf16.gmra.mxu3 %v3842_v19  ;;  %1399 = vmatpush.bf16.msra.mxu2 %v2702_v59  ;;  %v2398_v41 = vor.u32 %v3049_v35, %v2397_v34  ;;  %v2781_v42 = vld [vmem:[%s4618_s1 + $0x308] sm:$0xf]  ;;  %v3145_v43 = vld [vmem:[%s4618_s1 + $0x314] sm:$0xf0]  ;;  %v2770_v59 = vor.u32 %v3139_v52, %v2767_v55  ;;  %v3167_v20 = vld [vmem:[%s4618_s1 + $0x3cc] sm:$0xf] }
  0x61   : > { %1428 = vmatpush.bf16.msra.mxu3 %v2830_v0  ;;  %1370 = vmatpush.bf16.msra.mxu1 %v2574_v4  ;;  %v2525_v45 = vld [vmem:[%s4618_s1 + $0x108] sm:$0xf]  ;;  %v2782_v46 = vor.u32 %v3145_v43, %v2781_v42  ;;  %v3081_v47 = vld [vmem:[%s4618_s1 + $0x114] sm:$0xf0]  ;;  %v2898_v0 = vor.u32 %v3171_v61, %v2895_v62  ;;  %v2879_v21 = vld [vmem:[%s4618_s1 + $0x3d8] sm:$0xf0] }
  0x62   : > { %v2526_v49 = vor.u32 %v3081_v47, %v2525_v45  ;;  %v2882_v22 = vor.u32 %v3167_v20, %v2879_v21  ;;  %v3103_v24 = vld [vmem:[%s4618_s1 + $0x1cc] sm:$0xf]  ;;  %v2623_v25 = vld [vmem:[%s4618_s1 + $0x1d8] sm:$0xf0] }
  0x63   : > { %1342 = vmatpush.bf16.msra.mxu0 %v2430_v9  ;;  %v2642_v9 = vor.u32 %v3107_v6, %v2639_v7  ;;  %v2626_v29 = vor.u32 %v3103_v24, %v2623_v25  ;;  %v3131_v34 = vld [vmem:[%s4618_s1 + $0x2ac] sm:$0xf]  ;;  %v2735_v35 = vld [vmem:[%s4618_s1 + $0x2b8] sm:$0xf0] }
  0x64   : > { %1400 = vmatpush.bf16.msra.mxu2 %v2686_v8  ;;  %v3135_v8 = vld [vmem:[%s4618_s1 + $0x2cc] sm:$0xf]  ;;  %v2738_v42 = vor.u32 %v3131_v34, %v2735_v35  ;;  %v2479_v43 = vld [vmem:[%s4618_s1 + $0xb8] sm:$0xf0] }
  0x65   : > { %1429 = vmatpush.bf16.msra.mxu3 %v2814_v13  ;;  %1371 = vmatpush.bf16.msra.mxu1 %v2558_v15  ;;  %v2754_v14 = vor.u32 %v3135_v8, %v2751_v10  ;;  %v2498_v15 = vor.u32 %v3071_v11, %v2495_v12  ;;  %v3163_v45 = vld [vmem:[%s4618_s1 + $0x3ac] sm:$0xf]  ;;  %v2607_v55 = vld [vmem:[%s4618_s1 + $0x1b8] sm:$0xf0] }
  0x66   : > { %v3099_v52 = vld [vmem:[%s4618_s1 + $0x1ac] sm:$0xf]  ;;  %v2719_v61 = vld [vmem:[%s4618_s1 + $0x298] sm:$0xf0] }
  0x67   : > { %1343 = vmatpush.bf16.msra.mxu0 %v2414_v27  ;;  %v3127_v58 = vld [vmem:[%s4618_s1 + $0x28c] sm:$0xf]  ;;  %v2610_v60 = vor.u32 %v3099_v52, %v2607_v55  ;;  %v2591_v12 = vld [vmem:[%s4618_s1 + $0x198] sm:$0xf0] }
  0x68   : > { %1401 = vmatpush.bf16.msra.mxu2 %v2670_v23  ;;  %v3063_v62 = vld [vmem:[%s4618_s1 + $0x8c] sm:$0xf]  ;;  %v2703_v21 = vld [vmem:[%s4618_s1 + $0x278] sm:$0xf0] }
  0x69   : > { %1430 = vmatpush.bf16.msra.mxu3 %v2798_v28  ;;  %1372 = vmatpush.bf16.msra.mxu1 %v2542_v32  ;;  %v3095_v6 = vld [vmem:[%s4618_s1 + $0x18c] sm:$0xf]  ;;  %v2575_v34 = vld [vmem:[%s4618_s1 + $0x178] sm:$0xf0] }
  0x6a   : > { %v2594_v25 = vor.u32 %v3095_v6, %v2591_v12  ;;  %v2431_v55 = vld [vmem:[%s4618_s1 + $0x58] sm:$0xf0]  ;;  %v3115_v12 = vld [vmem:[%s4618_s1 + $0x22c] sm:$0xf] }
  0x6b   : > { %1344 = vmatpush.bf16.msra.mxu0 %v2398_v41 }
  0x6c   : > { %1402 = vmatpush.bf16.msra.mxu2 %v2654_v40  ;;  %v3067_v40 = vld [vmem:[%s4618_s1 + $0xac] sm:$0xf] }
  0x6d   : > { %1431 = vmatpush.bf16.msra.mxu3 %v2782_v46  ;;  %1373 = vmatpush.bf16.msra.mxu1 %v2526_v49  ;;  %v2863_v46 = vld [vmem:[%s4618_s1 + $0x3b8] sm:$0xf0]  ;;  %v2482_v47 = vor.u32 %v3067_v40, %v2479_v43 }
  0x6e   : > { %1229 = vmatmul.bf16.vlgmr.msrb.gmra.mxu0 %v3561_v48  ;;  %1258 = vmatmul.bf16.vlgmr.msrb.gmra.mxu1 %v3568_v53  ;;  %v2866_v49 = vor.u32 %v3163_v45, %v2863_v46  ;;  %v3119_v45 = vld [vmem:[%s4618_s1 + $0x24c] sm:$0xf]  ;;  %v2687_v46 = vld [vmem:[%s4618_s1 + $0x258] sm:$0xf0] }
  0x6f   : > { %1287 = vmatmul.bf16.vlgmr.msrb.gmra.mxu2 %v3570_v54  ;;  %1453 = vmatpush.bf16.msrb.mxu0 %v2514_v63  ;;  %v2463_v63 = vld [vmem:[%s4618_s1 + $0x98] sm:$0xf0]  ;;  %v2690_v52 = vor.u32 %v3119_v45, %v2687_v46 }
  0x70   : > { %1316 = vmatmul.bf16.vlgmr.msrb.gmra.mxu3 %v3578_v57  ;;  %1511 = vmatpush.bf16.msrb.mxu2 %v2770_v59  ;;  %v2466_v20 = vor.u32 %v3063_v62, %v2463_v63 }
  0x71   : > { %1540 = vmatpush.bf16.msrb.mxu3 %v2898_v0  ;;  %1482 = vmatpush.bf16.msrb.mxu1 %v2642_v9 }
  0x73   : > { %1454 = vmatpush.bf16.msrb.mxu0 %v2498_v15 }
  0x74   : > { %1512 = vmatpush.bf16.msrb.mxu2 %v2754_v14 }
  0x75   : > { %1541 = vmatpush.bf16.msrb.mxu3 %v2882_v22  ;;  %1483 = vmatpush.bf16.msrb.mxu1 %v2626_v29  ;;  %v3059_v22 = vld [vmem:[%s4618_s1 + $0x6c] sm:$0xf]  ;;  %v2831_v29 = vld [vmem:[%s4618_s1 + $0x378] sm:$0xf0] }
  0x77   : > { %1455 = vmatpush.bf16.msrb.mxu0 %v2482_v47  ;;  %v3055_v47 = vld [vmem:[%s4618_s1 + $0x4c] sm:$0xf] }
  0x78   : > { %1513 = vmatpush.bf16.msrb.mxu2 %v2738_v42 }
  0x79   : > { %1542 = vmatpush.bf16.msrb.mxu3 %v2866_v49  ;;  %1484 = vmatpush.bf16.msrb.mxu1 %v2610_v60 }
  0x7b   : > { %1456 = vmatpush.bf16.msrb.mxu0 %v2466_v20 }
  0x7d   : > { %1485 = vmatpush.bf16.msrb.mxu1 %v2594_v25  ;;  %v3147_v25 = vld [vmem:[%s4618_s1 + $0x32c] sm:$0xf] }
  0x7e   : > { %1234 = vmatmul.bf16.gmra.mxu0 %v3673_v44  ;;  %1263 = vmatmul.bf16.gmra.mxu1 %v3684_v50 }
  0x7f   : > { %1292 = vmatmul.bf16.gmra.mxu2 %v3686_v51 }
  0x80   : > { %1321 = vmatmul.bf16.gmra.mxu3 %v3694_v56 }
  0x8e   : > { %1239 = vmatmul.bf16.gmra.mxu0 %v3768_v36  ;;  %1268 = vmatmul.bf16.gmra.mxu1 %v3770_v37 }
  0x8f   : > { %1297 = vmatmul.bf16.gmra.mxu2 %v3772_v38 }
  0x90   : > { %1326 = vmatmul.bf16.gmra.mxu3 %v3774_v39 }
  0x9e   : > { %1244 = vmatmul.bf16.gmra.mxu0 %v3836_v16  ;;  %1273 = vmatmul.bf16.gmra.mxu1 %v3838_v17 }
  0x9f   : > { %1302 = vmatmul.bf16.gmra.mxu2 %v3840_v18 }
  0xa0   : > { %1331 = vmatmul.bf16.gmra.mxu3 %v3842_v19 }
  0xab   : > { %v1114_v3 = vpop.f32.mrf.mxu0  ;;  %v1143_v5 = vpop.f32.mrf.mxu1 }
  0xac   : > { %v1115_v4 = vadd.f32 %v1114_v3, %v4032_v2  ;;  %v2722_v3 = vor.u32 %v3127_v58, %v2719_v61  ;;  %v3151_v58 = vld [vmem:[%s4618_s1 + $0x34c] sm:$0xf] }
  0xae   : > { %v1144_v13 = vadd.f32 %v1143_v5, %v1115_v4  ;;  %1345 = vmatmul.bf16.vlgmr.msra.gmra.mxu0 %v3561_v48  ;;  %1374 = vmatmul.bf16.vlgmr.msra.gmra.mxu1 %v3568_v53  ;;  %v3159_v4 = vld [vmem:[%s4618_s1 + $0x38c] sm:$0xf]  ;;  %v2847_v5 = vld [vmem:[%s4618_s1 + $0x398] sm:$0xf0] }
  0xaf   : > { %1403 = vmatmul.bf16.vlgmr.msra.gmra.mxu2 %v3570_v54  ;;  %v2850_v11 = vor.u32 %v3159_v4, %v2847_v5  ;;  %v2559_v4 = vld [vmem:[%s4618_s1 + $0x158] sm:$0xf0] }
  0xb0   : > { %1432 = vmatmul.bf16.vlgmr.msra.gmra.mxu3 %v3578_v57  ;;  %1514 = vmatpush.bf16.msrb.mxu2 %v2722_v3  ;;  %v3087_v3 = vld [vmem:[%s4618_s1 + $0x14c] sm:$0xf] }
  0xb1   : > { %1543 = vmatpush.bf16.msrb.mxu3 %v2850_v11 }
  0xb2   : > { %v1172_v23 = vpop.f32.mrf.mxu2 }
  0xb3   : > { %v1173_v26 = vadd.f32 %v1172_v23, %v1144_v13  ;;  %v1201_v27 = vpop.f32.mrf.mxu3  ;;  %v1116_v28 = vpop.f32.mrf.mxu0  ;;  %v3123_v13 = vld [vmem:[%s4618_s1 + $0x26c] sm:$0xf] }
  0xb4   : > { %v1117_v30 = vadd.f32 %v1116_v28, %v4032_v2  ;;  %v1145_v31 = vpop.f32.mrf.mxu1  ;;  %v3155_v28 = vld [vmem:[%s4618_s1 + $0x36c] sm:$0xf] }
  0xb5   : > { %v4070_v32 = vadd.f32 %v1201_v27, %v1173_v26  ;;  %v2706_v26 = vor.u32 %v3123_v13, %v2703_v21  ;;  %v2447_v27 = vld [vmem:[%s4618_s1 + $0x78] sm:$0xf0] }
  0xb6   : > { %v1146_v33 = vadd.f32 %v1145_v31, %v1117_v30  ;;  %v2834_v31 = vor.u32 %v3155_v28, %v2831_v29  ;;  %v2671_v13 = vld [vmem:[%s4618_s1 + $0x238] sm:$0xf0]  ;;  %v3083_v28 = vld [vmem:[%s4618_s1 + $0x12c] sm:$0xf] }
  0xb7   : > { %v1569_v41 = vmul.f32 %v4070_v32, %v4070_v32  ;;  %1515 = vmatpush.bf16.msrb.mxu2 %v2706_v26 }
  0xb8   : > { %1544 = vmatpush.bf16.msrb.mxu3 %v2834_v31  ;;  %v2543_v31 = vld [vmem:[%s4618_s1 + $0x138] sm:$0xf0] }
  0xb9   : > { %v1601_v59 = vmul.f32 %v1569_v41, %v4070_v32  ;;  %v2450_v41 = vor.u32 %v3059_v22, %v2447_v27  ;;  %v2674_v22 = vor.u32 %v3115_v12, %v2671_v13  ;;  %v2799_v27 = vld [vmem:[%s4618_s1 + $0x338] sm:$0xf0] }
  0xba   : > { %v1174_v0 = vpop.f32.mrf.mxu2 }
  0xbb   : > { %v1633_v7 = vmul.f32 0.044715, %v1601_v59  ;;  %v1175_v8 = vadd.f32 %v1174_v0, %v1146_v33  ;;  %v1203_v9 = vpop.f32.mrf.mxu3  ;;  %v1119_v10 = vpop.f32.mrf.mxu0  ;;  %v3091_v33 = vld [vmem:[%s4618_s1 + $0x16c] sm:$0xf]  ;;  %v2815_v59 = vld [vmem:[%s4618_s1 + $0x358] sm:$0xf0]  ;;  %1457 = vmatpush.bf16.msrb.mxu0 %v2450_v41  ;;  %1516 = vmatpush.bf16.msrb.mxu2 %v2690_v52 }
  0xbc   : > { %v1120_v14 = vadd.f32 %v1119_v10, %v4032_v2  ;;  %v1148_v15 = vpop.f32.mrf.mxu1  ;;  %v2578_v43 = vor.u32 %v3091_v33, %v2575_v34  ;;  %v2818_v0 = vor.u32 %v3151_v58, %v2815_v59  ;;  %v2562_v10 = vor.u32 %v3087_v3, %v2559_v4  ;;  %v2655_v41 = vld [vmem:[%s4618_s1 + $0x218] sm:$0xf0] }
  0xbd   : > { %v1665_v23 = vadd.f32 %v1633_v7, %v4070_v32  ;;  %v4134_v24 = vadd.f32 %v1203_v9, %v1175_v8  ;;  %v2434_v7 = vor.u32 %v3055_v47, %v2431_v55  ;;  %v2399_v52 = vld [vmem:[%s4618_s1 + $0x18] sm:$0xf0] }
  0xbe   : > { %v1149_v30 = vadd.f32 %v1148_v15, %v1120_v14  ;;  %1350 = vmatmul.bf16.gmra.mxu0 %v3673_v44  ;;  %1379 = vmatmul.bf16.gmra.mxu1 %v3684_v50  ;;  %v3051_v14 = vld [vmem:[%s4618_s1 + $0x2c] sm:$0xf]  ;;  %v2527_v4 = vld [vmem:[%s4618_s1 + $0x118] sm:$0xf0] }
  0xbf   : > { %v1697_v35 = vmul.f32 0.7978846, %v1665_v23  ;;  %v1573_v40 = vmul.f32 %v4134_v24, %v4134_v24  ;;  %1408 = vmatmul.bf16.gmra.mxu2 %v3686_v51  ;;  %1486 = vmatpush.bf16.msrb.mxu1 %v2578_v43  ;;  %v2415_v23 = vld [vmem:[%s4618_s1 + $0x38] sm:$0xf0] }
  0xc0   : > { %1437 = vmatmul.bf16.gmra.mxu3 %v3694_v56  ;;  %1458 = vmatpush.bf16.msrb.mxu0 %v2434_v7  ;;  %v2418_v26 = vor.u32 %v3051_v14, %v2415_v23 }
  0xc1   : > { %3215 = vtanh.f32 %v1697_v35  ;;  %v1605_v42 = vmul.f32 %v1573_v40, %v4134_v24  ;;  %1545 = vmatpush.bf16.msrb.mxu3 %v2818_v0  ;;  %1517 = vmatpush.bf16.msrb.mxu2 %v2674_v22  ;;  %v2546_v35 = vor.u32 %v3083_v28, %v2543_v31  ;;  %v3111_v40 = vld [vmem:[%s4618_s1 + $0x20c] sm:$0xf] }
  0xc2   : > { %v1177_v49 = vpop.f32.mrf.mxu2  ;;  %v2658_v47 = vor.u32 %v3111_v40, %v2655_v41 }
  0xc3   : > { %v1637_v60 = vmul.f32 0.044715, %v1605_v42  ;;  %v1178_v61 = vadd.f32 %v1177_v49, %v1149_v30  ;;  %v1206_v62 = vpop.f32.mrf.mxu3  ;;  %v1121_v63 = vpop.f32.mrf.mxu0  ;;  %1487 = vmatpush.bf16.msrb.mxu1 %v2562_v10  ;;  %v2802_v30 = vor.u32 %v3147_v25, %v2799_v27  ;;  %v3047_v49 = vld [vmem:[%s4618_s1 + $0xc] sm:$0xf] }
  0xc4   : > { %v1122_v5 = vadd.f32 %v1121_v63, %v4032_v2  ;;  %v1150_v6 = vpop.f32.mrf.mxu1  ;;  %1459 = vmatpush.bf16.msrb.mxu0 %v2418_v26  ;;  %v2402_v59 = vor.u32 %v3047_v49, %v2399_v52 }
  0xc5   : > { %v1669_v8 = vadd.f32 %v1637_v60, %v4134_v24  ;;  %v4184_v9 = vadd.f32 %v1206_v62, %v1178_v61  ;;  %1546 = vmatpush.bf16.msrb.mxu3 %v2802_v30  ;;  %v3143_v60 = vld [vmem:[%s4618_s1 + $0x30c] sm:$0xf]  ;;  %v2783_v61 = vld [vmem:[%s4618_s1 + $0x318] sm:$0xf0]  ;;  %1518 = vmatpush.bf16.msrb.mxu2 %v2658_v47 }
  0xc6   : > { %v1151_v11 = vadd.f32 %v1150_v6, %v1122_v5  ;;  %v3079_v62 = vld [vmem:[%s4618_s1 + $0x10c] sm:$0xf]  ;;  %v2786_v3 = vor.u32 %v3143_v60, %v2783_v61 }
  0xc7   : > { %v3216_v15 = vpop.eup %3215  ;;  %v1701_v20 = vmul.f32 0.7978846, %v1669_v8  ;;  %v1577_v21 = vmul.f32 %v4184_v9, %v4184_v9  ;;  %1488 = vmatpush.bf16.msrb.mxu1 %v2546_v35  ;;  %v2530_v6 = vor.u32 %v3079_v62, %v2527_v4 }
  0xc8   : > { %v1761_v33 = vadd.f32 1.0, %v3216_v15  ;;  %1460 = vmatpush.bf16.msrb.mxu0 %v2402_v59 }
  0xc9   : > { %3217 = vtanh.f32 %v1701_v20  ;;  %v1609_v29 = vmul.f32 %v1577_v21, %v4184_v9  ;;  %1547 = vmatpush.bf16.msrb.mxu3 %v2786_v3 }
  0xca   : > { %v1179_v34 = vpop.f32.mrf.mxu2 }
  0xcb   : > { %v1641_v42 = vmul.f32 0.044715, %v1609_v29  ;;  %v1180_v43 = vadd.f32 %v1179_v34, %v1151_v11  ;;  %v1208_v45 = vpop.f32.mrf.mxu3  ;;  %v1124_v46 = vpop.f32.mrf.mxu0  ;;  %v1793_v11 = vmul.f32 0.5, %v1761_v33  ;;  %1489 = vmatpush.bf16.msrb.mxu1 %v2530_v6 }
  0xcc   : > { %v1125_v55 = vadd.f32 %v1124_v46, %v4032_v2  ;;  %v1153_v58 = vpop.f32.mrf.mxu1 }
  0xcd   : > { %v1673_v63 = vadd.f32 %v1641_v42, %v4184_v9  ;;  %v4236_v0 = vadd.f32 %v1208_v45, %v1180_v43  ;;  %v4249_v25 = vmul.f32 %v1793_v11, %v4070_v32 }
  0xce   : > { %v1154_v5 = vadd.f32 %v1153_v58, %v1125_v55  ;;  %1355 = vmatmul.bf16.gmra.mxu0 %v3768_v36  ;;  %1384 = vmatmul.bf16.gmra.mxu1 %v3770_v37 }
  0xcf   : > { %v3218_v7 = vpop.eup %3217  ;;  %v1705_v8 = vmul.f32 0.7978846, %v1673_v63  ;;  %v1581_v10 = vmul.f32 %v4236_v0, %v4236_v0  ;;  %1413 = vmatmul.bf16.gmra.mxu2 %v3772_v38 }
  0xd0   : > { %v1765_v12 = vadd.f32 1.0, %v3218_v7  ;;  %1442 = vmatmul.bf16.gmra.mxu3 %v3774_v39 }
  0xd1   : > { %v1613_v13 = vmul.f32 %v1581_v10, %v4236_v0  ;;  %3219 = vtanh.f32 %v1705_v8 }
  0xd2   : > { %v1797_v14 = vmul.f32 0.5, %v1765_v12  ;;  %v1182_v15 = vpop.f32.mrf.mxu2 }
  0xd3   : > { %v1645_v20 = vmul.f32 0.044715, %v1613_v13  ;;  %v1183_v21 = vadd.f32 %v1182_v15, %v1154_v5  ;;  %v1211_v22 = vpop.f32.mrf.mxu3  ;;  %v1126_v23 = vpop.f32.mrf.mxu0 }
  0xd4   : > { %v4252_v26 = vmul.f32 %v1797_v14, %v4134_v24  ;;  %v1127_v27 = vadd.f32 %v1126_v23, %v4032_v2  ;;  %v1155_v28 = vpop.f32.mrf.mxu1 }
  0xd5   : > { %v1677_v29 = vadd.f32 %v1645_v20, %v4236_v0  ;;  %v4256_v30 = vadd.f32 %v1211_v22, %v1183_v21 }
  0xd6   : > { %v1857_v31 = vpack.c.bf16 %v4252_v26, %v4249_v25  ;;  %v1156_v33 = vadd.f32 %v1155_v28, %v1127_v27 }
  0xd7   : > { %v1709_v34 = vmul.f32 0.7978846, %v1677_v29  ;;  %v1585_v35 = vmul.f32 %v4256_v30, %v4256_v30  ;;  %v3220_v32 = vpop.eup %3219 }
  0xd8   : > { %v1769_v49 = vadd.f32 1.0, %v3220_v32 }
  0xd9   : > { %v1617_v40 = vmul.f32 %v1585_v35, %v4256_v30  ;;  %3221 = vtanh.f32 %v1709_v34 }
  0xda   : > { %v1184_v24 = vpop.f32.mrf.mxu2  ;;  %v1801_v63 = vmul.f32 0.5, %v1769_v49 }
  0xdb   : > { %v1649_v41 = vmul.f32 0.044715, %v1617_v40  ;;  %v1185_v42 = vadd.f32 %v1184_v24, %v1156_v33  ;;  %v1213_v43 = vpop.f32.mrf.mxu3  ;;  %v1129_v45 = vpop.f32.mrf.mxu0 }
  0xdc   : > { %v1130_v46 = vadd.f32 %v1129_v45, %v4032_v2  ;;  %v1158_v47 = vpop.f32.mrf.mxu1  ;;  %v4276_v13 = vmul.f32 %v1801_v63, %v4184_v9  ;;  %v3181_v45 = vld [vmem:[%s4620_s3 + $0x38] sm:$0xff] }
  0xdd   : > { %v1681_v52 = vadd.f32 %v1649_v41, %v4256_v30  ;;  %v4265_v55 = vadd.f32 %v1213_v43, %v1185_v42  ;;  %2133 = vmatpush.bf16.msra.mxu0 %v3181_v45  ;;  %v3176_v45 = vld [vmem:[%s4620_s3 + $0x10] sm:$0xff] }
  0xde   : > { %v1159_v58 = vadd.f32 %v1158_v47, %v1130_v46  ;;  %1360 = vmatmul.bf16.gmra.mxu0 %v3836_v16  ;;  %1389 = vmatmul.bf16.gmra.mxu1 %v3838_v17  ;;  %v3189_v46 = vld [vmem:[%s4620_s3 + $0x78] sm:$0xff] }
  0xdf   : > { %v3222_v59 = vpop.eup %3221  ;;  %v1713_v60 = vmul.f32 0.7978846, %v1681_v52  ;;  %v1589_v61 = vmul.f32 %v4265_v55, %v4265_v55  ;;  %1418 = vmatmul.bf16.gmra.mxu2 %v3840_v18  ;;  %2162 = vmatpush.bf16.msra.mxu1 %v3189_v46  ;;  %v3184_v46 = vld [vmem:[%s4620_s3 + $0x50] sm:$0xff] }
  0xe0   : > { %1447 = vmatmul.bf16.gmra.mxu3 %v3842_v19  ;;  %v1773_v62 = vadd.f32 1.0, %v3222_v59 }
  0xe1   : > { %v1621_v3 = vmul.f32 %v1589_v61, %v4265_v55  ;;  %3223 = vtanh.f32 %v1713_v60  ;;  %v3180_v61 = vld [vmem:[%s4620_s3 + $0x30] sm:$0xff] }
  0xe2   : > { %v1187_v4 = vpop.f32.mrf.mxu2  ;;  %v1805_v5 = vmul.f32 0.5, %v1773_v62  ;;  %2134 = vmatpush.bf16.msra.mxu0 %v3180_v61 }
  0xe3   : > { %v1653_v6 = vmul.f32 0.044715, %v1621_v3  ;;  %v1188_v7 = vadd.f32 %v1187_v4, %v1159_v58  ;;  %v1216_v8 = vpop.f32.mrf.mxu3  ;;  %v1131_v10 = vpop.f32.mrf.mxu0 }
  0xe4   : > { %v1132_v11 = vadd.f32 %v1131_v10, %v4032_v2  ;;  %v1160_v12 = vpop.f32.mrf.mxu1  ;;  %v4279_v14 = vmul.f32 %v1805_v5, %v4236_v0 }
  0xe5   : > { %v1685_v15 = vadd.f32 %v1653_v6, %v4265_v55  ;;  %v4282_v20 = vadd.f32 %v1216_v8, %v1188_v7 }
  0xe6   : > { %v1161_v21 = vadd.f32 %v1160_v12, %v1132_v11  ;;  %v1861_v22 = vpack.c.bf16 %v4279_v14, %v4276_v13 }
  0xe7   : > { %v1717_v23 = vmul.f32 0.7978846, %v1685_v15  ;;  %v1593_v27 = vmul.f32 %v4282_v20, %v4282_v20  ;;  %v3224_v2 = vpop.eup %3223 }
  0xe8   : > { %v1777_v32 = vadd.f32 1.0, %v3224_v2  ;;  %v3186_v2 = vld [vmem:[%s4620_s3 + $0x60] sm:$0xff] }
  0xe9   : > { %v1625_v28 = vmul.f32 %v1593_v27, %v4282_v20  ;;  %3225 = vtanh.f32 %v1717_v23  ;;  %v3178_v27 = vld [vmem:[%s4620_s3 + $0x20] sm:$0xff] }
  0xea   : > { %v1189_v9 = vpop.f32.mrf.mxu2  ;;  %v1809_v47 = vmul.f32 0.5, %v1777_v32 }
  0xeb   : > { %v1657_v29 = vmul.f32 0.044715, %v1625_v28  ;;  %v1190_v0 = vadd.f32 %v1189_v9, %v1161_v21  ;;  %v1218_v33 = vpop.f32.mrf.mxu3  ;;  %v1230_v34 = vpop.f32.mrf.mxu0 }
  0xec   : > { %v1259_v35 = vpop.f32.mrf.mxu1  ;;  %v4315_v63 = vmul.f32 %v1809_v47, %v4256_v30  ;;  %v3179_v30 = vld [vmem:[%s4620_s3 + $0x28] sm:$0xff] }
  0xed   : > { %v1689_v40 = vadd.f32 %v1657_v29, %v4282_v20  ;;  %v4290_v24 = vadd.f32 %v1218_v33, %v1190_v0  ;;  %2135 = vmatpush.bf16.msra.mxu0 %v3179_v30  ;;  %v3182_v30 = vld [vmem:[%s4620_s3 + $0x40] sm:$0xff] }
  0xee   : > { %1461 = vmatmul.bf16.vlgmr.msrb.gmra.mxu0 %v3561_v48  ;;  %1490 = vmatmul.bf16.vlgmr.msrb.gmra.mxu1 %v3568_v53  ;;  %v4306_v53 = vperm.slane %v4029_v1, 1 }
  0xef   : > { %v3226_v41 = vpop.eup %3225  ;;  %v1721_v42 = vmul.f32 0.7978846, %v1689_v40  ;;  %v1597_v43 = vmul.f32 %v4290_v24, %v4290_v24  ;;  %1519 = vmatmul.bf16.vlgmr.msrb.gmra.mxu2 %v3570_v54 }
  0xf0   : > { %1548 = vmatmul.bf16.vlgmr.msrb.gmra.mxu3 %v3578_v57  ;;  %v1781_v48 = vadd.f32 1.0, %v3226_v41  ;;  %v3188_v57 = vld [vmem:[%s4620_s3 + $0x70] sm:$0xff]  ;;  %v1231_v5 = vadd.f32 %v1230_v34, %v4306_v53  ;;  %v3177_v34 = vld [vmem:[%s4620_s3 + $0x18] sm:$0xff] }
  0xf1   : > { %v1629_v49 = vmul.f32 %v1597_v43, %v4290_v24  ;;  %3227 = vtanh.f32 %v1721_v42  ;;  %2163 = vmatpush.bf16.msra.mxu1 %v3188_v57  ;;  %2136 = vmatpush.bf16.msra.mxu0 %v3178_v27 }
  0xf2   : > { %v1288_v54 = vpop.f32.mrf.mxu2  ;;  %v1813_v52 = vmul.f32 0.5, %v1781_v48  ;;  %v1260_v11 = vadd.f32 %v1259_v35, %v1231_v5  ;;  %v3185_v35 = vld [vmem:[%s4620_s3 + $0x58] sm:$0xff] }
  0xf3   : > { %v1661_v58 = vmul.f32 0.044715, %v1629_v49  ;;  %v1317_v59 = vpop.f32.mrf.mxu3  ;;  %v1232_v60 = vpop.f32.mrf.mxu0 }
  0xf4   : > { %v1261_v62 = vpop.f32.mrf.mxu1  ;;  %v4318_v3 = vmul.f32 %v1813_v52, %v4265_v55  ;;  %v1233_v6 = vadd.f32 %v1232_v60, %v4306_v53  ;;  %v3187_v55 = vld [vmem:[%s4620_s3 + $0x68] sm:$0xff]  ;;  %v1289_v0 = vadd.f32 %v1288_v54, %v1260_v11 }
  0xf5   : > { %v1693_v4 = vadd.f32 %v1661_v58, %v4290_v24  ;;  %2164 = vmatpush.bf16.msra.mxu1 %v3187_v55  ;;  %2137 = vmatpush.bf16.msra.mxu0 %v3177_v34 }
  0xf6   : > { %v1865_v7 = vpack.c.bf16 %v4318_v3, %v4315_v63  ;;  %v1262_v12 = vadd.f32 %v1261_v62, %v1233_v6 }
  0xf7   : > { %v1725_v8 = vmul.f32 0.7978846, %v1693_v4  ;;  %v3228_v10 = vpop.eup %3227 }
  0xf8   : > { %v1785_v29 = vadd.f32 1.0, %v3228_v10 }
  0xf9   : > { %3229 = vtanh.f32 %v1725_v8  ;;  %2165 = vmatpush.bf16.msra.mxu1 %v3186_v2  ;;  %2138 = vmatpush.bf16.msra.mxu0 %v3176_v45  ;;  %v3174_v8 = vld [vmem:[%s4620_s3] sm:$0xff] }
  0xfa   : > { %v1290_v15 = vpop.f32.mrf.mxu2  ;;  %v1817_v41 = vmul.f32 0.5, %v1785_v29 }
  0xfb   : > { %v1319_v21 = vpop.f32.mrf.mxu3  ;;  %v1235_v23 = vpop.f32.mrf.mxu0  ;;  %v1291_v28 = vadd.f32 %v1290_v15, %v1262_v12 }
  0xfc   : > { %v1264_v9 = vpop.f32.mrf.mxu1  ;;  %v4360_v47 = vmul.f32 %v1817_v41, %v4282_v20  ;;  %v1236_v52 = vadd.f32 %v1235_v23, %v4306_v53  ;;  %v3175_v20 = vld [vmem:[%s4620_s3 + $0x8] sm:$0xff] }
  0xfd   : > { %v4346_v32 = vadd.f32 %v1319_v21, %v1291_v28  ;;  %2166 = vmatpush.bf16.msra.mxu1 %v3185_v35  ;;  %2139 = vmatpush.bf16.msra.mxu0 %v3175_v20 }
  0xfe   : > { %1466 = vmatmul.bf16.gmra.mxu0 %v3673_v44  ;;  %1495 = vmatmul.bf16.gmra.mxu1 %v3684_v50  ;;  %v4349_v44 = vadd.f32 %v1317_v59, %v1289_v0  ;;  %v1265_v57 = vadd.f32 %v1264_v9, %v1236_v52 }
  0xff   : > { %v3230_v33 = vpop.eup %3229  ;;  %1524 = vmatmul.bf16.gmra.mxu2 %v3686_v51 }
 0x100   : > { %1553 = vmatmul.bf16.gmra.mxu3 %v3694_v56  ;;  %v1789_v40 = vadd.f32 1.0, %v3230_v33  ;;  %v1574_v56 = vmul.f32 %v4346_v32, %v4346_v32  ;;  %v1570_v54 = vmul.f32 %v4349_v44, %v4349_v44 }
 0x101   : > { %2167 = vmatpush.bf16.msra.mxu1 %v3184_v46  ;;  %2140 = vmatpush.bf16.msra.mxu0 %v3174_v8 }
 0x102   : > { %v1293_v50 = vpop.f32.mrf.mxu2  ;;  %v1821_v51 = vmul.f32 0.5, %v1789_v40  ;;  %v1606_v60 = vmul.f32 %v1574_v56, %v4346_v32  ;;  %v1602_v61 = vmul.f32 %v1570_v54, %v4349_v44  ;;  %v3197_v40 = vld [vmem:[%s4620_s3 + $0xb8] sm:$0xff]  ;;  %v3196_v54 = vld [vmem:[%s4620_s3 + $0xb0] sm:$0xff] }
 0x103   : > { %v1322_v42 = vpop.f32.mrf.mxu3  ;;  %v1237_v43 = vpop.f32.mrf.mxu0  ;;  %v1294_v15 = vadd.f32 %v1293_v50, %v1265_v57  ;;  %2191 = vmatpush.bf16.msra.mxu2 %v3197_v40  ;;  %v3195_v57 = vld [vmem:[%s4620_s3 + $0xa8] sm:$0xff] }
 0x104   : > { %v1266_v48 = vpop.f32.mrf.mxu1  ;;  %v4363_v49 = vmul.f32 %v1821_v51, %v4290_v24  ;;  %v1238_v58 = vadd.f32 %v1237_v43, %v4306_v53  ;;  %v3183_v24 = vld [vmem:[%s4620_s3 + $0x48] sm:$0xff]  ;;  %v1638_v55 = vmul.f32 0.044715, %v1606_v60  ;;  %v1634_v12 = vmul.f32 0.044715, %v1602_v61 }
 0x105   : > { %2168 = vmatpush.bf16.msra.mxu1 %v3183_v24  ;;  %v4393_v2 = vadd.f32 %v1322_v42, %v1294_v15 }
 0x106   : > { %v1869_v59 = vpack.c.bf16 %v4363_v49, %v4360_v47  ;;  %v1267_v62 = vadd.f32 %v1266_v48, %v1238_v58  ;;  %v1670_v21 = vadd.f32 %v1638_v55, %v4346_v32  ;;  %v1666_v27 = vadd.f32 %v1634_v12, %v4349_v44 }
 0x107   : > { %2192 = vmatpush.bf16.msra.mxu2 %v3196_v54 }
 0x108   : > { %v1702_v0 = vmul.f32 0.7978846, %v1670_v21  ;;  %v1698_v33 = vmul.f32 0.7978846, %v1666_v27 }
 0x109   : > { %2169 = vmatpush.bf16.msra.mxu1 %v3182_v30 }
 0x10a   : > { %v1295_v4 = vpop.f32.mrf.mxu2  ;;  %3231 = vtanh.f32 %v1702_v0 }
 0x10b   : > { %v1324_v5 = vpop.f32.mrf.mxu3  ;;  %v1240_v6 = vpop.f32.mrf.mxu0  ;;  %v1296_v10 = vadd.f32 %v1295_v4, %v1267_v62  ;;  %3233 = vtanh.f32 %v1698_v33  ;;  %2193 = vmatpush.bf16.msra.mxu2 %v3195_v57 }
 0x10c   : > { %v1269_v11 = vpop.f32.mrf.mxu1  ;;  %v1241_v34 = vadd.f32 %v1240_v6, %v4306_v53 }
 0x10d   : > { %v4389_v23 = vadd.f32 %v1324_v5, %v1296_v10 }
 0x10e   : > { %1471 = vmatmul.bf16.gmra.mxu0 %v3768_v36  ;;  %1500 = vmatmul.bf16.gmra.mxu1 %v3770_v37  ;;  %v1270_v50 = vadd.f32 %v1269_v11, %v1241_v34 }
 0x10f   : > { %1529 = vmatmul.bf16.gmra.mxu2 %v3772_v38  ;;  %v1582_v36 = vmul.f32 %v4389_v23, %v4389_v23  ;;  %v1578_v38 = vmul.f32 %v4393_v2, %v4393_v2 }
 0x110   : > { %1558 = vmatmul.bf16.gmra.mxu3 %v3774_v39  ;;  %v3232_v52 = vpop.eup %3231 }
 0x111   : > { %v1614_v35 = vmul.f32 %v1582_v36, %v4389_v23  ;;  %v1610_v41 = vmul.f32 %v1578_v38, %v4393_v2  ;;  %v3234_v24 = vpop.eup %3233  ;;  %v1766_v62 = vadd.f32 1.0, %v3232_v52 }
 0x112   : > { %v1298_v28 = vpop.f32.mrf.mxu2 }
 0x113   : > { %v1327_v9 = vpop.f32.mrf.mxu3  ;;  %v1242_v29 = vpop.f32.mrf.mxu0  ;;  %v1646_v46 = vmul.f32 0.044715, %v1614_v35  ;;  %v1642_v58 = vmul.f32 0.044715, %v1610_v41  ;;  %v1299_v20 = vadd.f32 %v1298_v28, %v1270_v50  ;;  %v1798_v10 = vmul.f32 0.5, %v1766_v62 }
 0x114   : > { %v1271_v37 = vpop.f32.mrf.mxu1  ;;  %v1243_v39 = vadd.f32 %v1242_v29, %v4306_v53  ;;  %v3193_v29 = vld [vmem:[%s4620_s3 + $0x98] sm:$0xff] }
 0x115   : > { %v1678_v60 = vadd.f32 %v1646_v46, %v4389_v23  ;;  %v1674_v4 = vadd.f32 %v1642_v58, %v4393_v2  ;;  %v1830_v0 = vmul.f32 %v1798_v10, %v4346_v32  ;;  %v3192_v32 = vld [vmem:[%s4620_s3 + $0x90] sm:$0xff] }
 0x116   : > { %v1272_v51 = vadd.f32 %v1271_v37, %v1243_v39 }
 0x117   : > { %v1710_v8 = vmul.f32 0.7978846, %v1678_v60  ;;  %v1706_v11 = vmul.f32 0.7978846, %v1674_v4  ;;  %v3190_v4 = vld [vmem:[%s4620_s3 + $0x80] sm:$0xff] }
 0x119   : > { %3235 = vtanh.f32 %v1710_v8 }
 0x11a   : > { %v1300_v42 = vpop.f32.mrf.mxu2  ;;  %3237 = vtanh.f32 %v1706_v11 }
 0x11b   : > { %v1329_v43 = vpop.f32.mrf.mxu3  ;;  %v1245_v45 = vpop.f32.mrf.mxu0  ;;  %v1301_v56 = vadd.f32 %v1300_v42, %v1272_v51 }
 0x11c   : > { %v1274_v48 = vpop.f32.mrf.mxu1  ;;  %v1246_v15 = vadd.f32 %v1245_v45, %v4306_v53 }
 0x11d   : > { %v4413_v61 = vadd.f32 %v1329_v43, %v1301_v56 }
 0x11e   : > { %1476 = vmatmul.bf16.gmra.mxu0 %v3836_v16  ;;  %1505 = vmatmul.bf16.gmra.mxu1 %v3838_v17  ;;  %v4420_v16 = vadd.f32 %v1327_v9, %v1299_v20  ;;  %v1762_v17 = vadd.f32 1.0, %v3234_v24  ;;  %v4433_v9 = vperm.slane %v4029_v1, 2  ;;  %v1275_v37 = vadd.f32 %v1274_v48, %v1246_v15  ;;  %v3191_v48 = vld [vmem:[%s4620_s3 + $0x88] sm:$0xff] }
 0x11f   : > { %1534 = vmatmul.bf16.gmra.mxu2 %v3840_v18  ;;  %v1590_v30 = vmul.f32 %v4413_v61, %v4413_v61  ;;  %v3236_v51 = vpop.eup %3235 }
 0x120   : > { %1563 = vmatmul.bf16.gmra.mxu3 %v3842_v19  ;;  %v3194_v19 = vld [vmem:[%s4620_s3 + $0xa0] sm:$0xff]  ;;  %v1586_v12 = vmul.f32 %v4420_v16, %v4420_v16  ;;  %v1794_v27 = vmul.f32 0.5, %v1762_v17  ;;  %v3238_v45 = vpop.eup %3237  ;;  %v1774_v54 = vadd.f32 1.0, %v3236_v51 }
 0x121   : > { %2194 = vmatpush.bf16.msra.mxu2 %v3194_v19  ;;  %v1622_v28 = vmul.f32 %v1590_v30, %v4413_v61  ;;  %v1770_v24 = vadd.f32 1.0, %v3238_v45 }
 0x122   : > { %v1303_v5 = vpop.f32.mrf.mxu2  ;;  %v1618_v36 = vmul.f32 %v1586_v12, %v4420_v16  ;;  %v1826_v38 = vmul.f32 %v1794_v27, %v4349_v44 }
 0x123   : > { %v1332_v18 = vpop.f32.mrf.mxu3  ;;  %v1247_v6 = vpop.f32.mrf.mxu0  ;;  %v1654_v1 = vmul.f32 0.044715, %v1622_v28  ;;  %v1304_v43 = vadd.f32 %v1303_v5, %v1275_v37 }
 0x124   : > { %v1276_v55 = vpop.f32.mrf.mxu1  ;;  %v1248_v21 = vadd.f32 %v1247_v6, %v4306_v53  ;;  %v1858_v50 = vpack.c.bf16 %v1830_v0, %v1826_v38  ;;  %v1650_v42 = vmul.f32 0.044715, %v1618_v36 }
 0x125   : > { %2195 = vmatpush.bf16.msra.mxu2 %v3193_v29  ;;  %v1686_v46 = vadd.f32 %v1654_v1, %v4413_v61  ;;  %v4455_v58 = vadd.f32 %v1332_v18, %v1304_v43  ;;  %v1806_v18 = vmul.f32 0.5, %v1774_v54 }
 0x126   : > { %v1277_v33 = vadd.f32 %v1276_v55, %v1248_v21  ;;  %v1682_v52 = vadd.f32 %v1650_v42, %v4420_v16  ;;  %v1802_v55 = vmul.f32 0.5, %v1770_v24  ;;  %v3205_v42 = vld [vmem:[%s4620_s3 + $0xf8] sm:$0xff] }
 0x127   : > { %v1718_v60 = vmul.f32 0.7978846, %v1686_v46  ;;  %v1594_v8 = vmul.f32 %v4455_v58, %v4455_v58  ;;  %v1838_v12 = vmul.f32 %v1806_v18, %v4389_v23  ;;  %2220 = vmatpush.bf16.msra.mxu3 %v3205_v42 }
 0x128   : > { %v1714_v6 = vmul.f32 0.7978846, %v1682_v52  ;;  %v1834_v36 = vmul.f32 %v1802_v55, %v4393_v2 }
 0x129   : > { %2196 = vmatpush.bf16.msra.mxu2 %v3192_v32  ;;  %3239 = vtanh.f32 %v1718_v60  ;;  %v1626_v15 = vmul.f32 %v1594_v8, %v4455_v58 }
 0x12a   : > { %v1305_v53 = vpop.f32.mrf.mxu2  ;;  %3241 = vtanh.f32 %v1714_v6  ;;  %v3204_v6 = vld [vmem:[%s4620_s3 + $0xf0] sm:$0xff] }
 0x12b   : > { %v1334_v34 = vpop.f32.mrf.mxu3  ;;  %v1346_v39 = vpop.f32.mrf.mxu0  ;;  %v1306_v35 = vadd.f32 %v1305_v53, %v1277_v33  ;;  %v1658_v1 = vmul.f32 0.044715, %v1626_v15  ;;  %2221 = vmatpush.bf16.msra.mxu3 %v3204_v6 }
 0x12c   : > { %v1347_v40 = vadd.f32 %v1346_v39, %v4433_v9  ;;  %v1375_v41 = vpop.f32.mrf.mxu1  ;;  %v1862_v39 = vpack.c.bf16 %v1838_v12, %v1834_v36 }
 0x12d   : > { %v4449_v56 = vadd.f32 %v1334_v34, %v1306_v35  ;;  %2197 = vmatpush.bf16.msra.mxu2 %v3191_v48  ;;  %v1690_v43 = vadd.f32 %v1658_v1, %v4455_v58  ;;  %v3203_v1 = vld [vmem:[%s4620_s3 + $0xe8] sm:$0xff] }
 0x12e   : > { %2141 = vmatmul.bf16.vlgmr.msra.gmra.mxu0 %v1857_v31  ;;  %v1376_v44 = vadd.f32 %v1375_v41, %v1347_v40  ;;  %2170 = vmatmul.bf16.vlgmr.msra.gmra.mxu1 %v1858_v50 }
 0x12f   : > { %v1598_v57 = vmul.f32 %v4449_v56, %v4449_v56  ;;  %v3240_v23 = vpop.eup %3239  ;;  %2222 = vmatpush.bf16.msra.mxu3 %v3203_v1 }
 0x130   : > { %v3242_v41 = vpop.eup %3241  ;;  %v1782_v51 = vadd.f32 1.0, %v3240_v23 }
 0x131   : > { %2198 = vmatpush.bf16.msra.mxu2 %v3190_v4  ;;  %v1630_v19 = vmul.f32 %v1598_v57, %v4449_v56  ;;  %v1778_v46 = vadd.f32 1.0, %v3242_v41 }
 0x132   : > { %v1404_v20 = vpop.f32.mrf.mxu2 }
 0x133   : > { %v1405_v25 = vadd.f32 %v1404_v20, %v1376_v44  ;;  %v1433_v26 = vpop.f32.mrf.mxu3  ;;  %v1348_v31 = vpop.f32.mrf.mxu0  ;;  %v1662_v37 = vmul.f32 0.044715, %v1630_v19  ;;  %v1810_v57 = vmul.f32 0.5, %v1778_v46 }
 0x134   : > { %v1377_v62 = vpop.f32.mrf.mxu1  ;;  %v1349_v17 = vadd.f32 %v1348_v31, %v4433_v9  ;;  %v1722_v31 = vmul.f32 0.7978846, %v1690_v43 }
 0x135   : > { %v4462_v5 = vadd.f32 %v1433_v26, %v1405_v25  ;;  %v1694_v32 = vadd.f32 %v1662_v37, %v4449_v56  ;;  %v1814_v26 = vmul.f32 0.5, %v1782_v51 }
 0x136   : > { %v1378_v11 = vadd.f32 %v1377_v62, %v1349_v17 }
 0x137   : > { %v1571_v30 = vmul.f32 %v4462_v5, %v4462_v5  ;;  %v1726_v48 = vmul.f32 0.7978846, %v1694_v32  ;;  %v1846_v18 = vmul.f32 %v1814_v26, %v4413_v61 }
 0x139   : > { %v1603_v10 = vmul.f32 %v1571_v30, %v4462_v5 }
 0x13a   : > { %v1406_v21 = vpop.f32.mrf.mxu2 }
 0x13b   : > { %v1635_v27 = vmul.f32 0.044715, %v1603_v10  ;;  %v1407_v28 = vadd.f32 %v1406_v21, %v1378_v11  ;;  %v1435_v29 = vpop.f32.mrf.mxu3  ;;  %v1351_v0 = vpop.f32.mrf.mxu0  ;;  %v1842_v11 = vmul.f32 %v1810_v57, %v4420_v16 }
 0x13c   : > { %v1352_v33 = vadd.f32 %v1351_v0, %v4433_v9  ;;  %v1380_v53 = vpop.f32.mrf.mxu1 }
 0x13d   : > { %v1667_v38 = vadd.f32 %v1635_v27, %v4462_v5  ;;  %v4476_v34 = vadd.f32 %v1435_v29, %v1407_v28  ;;  %v1866_v28 = vpack.c.bf16 %v1846_v18, %v1842_v11 }
 0x13e   : > { %2146 = vmatmul.bf16.gmra.mxu0 %v1861_v22  ;;  %v1381_v2 = vadd.f32 %v1380_v53, %v1352_v33  ;;  %2175 = vmatmul.bf16.gmra.mxu1 %v1862_v39 }
 0x13f   : > { %v1699_v35 = vmul.f32 0.7978846, %v1667_v38  ;;  %v1575_v40 = vmul.f32 %v4476_v34, %v4476_v34 }
 0x141   : > { %v1607_v50 = vmul.f32 %v1575_v40, %v4476_v34  ;;  %3243 = vtanh.f32 %v1699_v35 }
 0x142   : > { %v1409_v13 = vpop.f32.mrf.mxu2  ;;  %3245 = vtanh.f32 %v1726_v48 }
 0x143   : > { %v1639_v14 = vmul.f32 0.044715, %v1607_v50  ;;  %v1410_v22 = vadd.f32 %v1409_v13, %v1381_v2  ;;  %v1438_v44 = vpop.f32.mrf.mxu3  ;;  %v1353_v45 = vpop.f32.mrf.mxu0 }
 0x144   : > { %v1382_v54 = vpop.f32.mrf.mxu1  ;;  %v1354_v25 = vadd.f32 %v1353_v45, %v4433_v9 }
 0x145   : > { %v1671_v52 = vadd.f32 %v1639_v14, %v4476_v34  ;;  %v4490_v20 = vadd.f32 %v1438_v44, %v1410_v22 }
 0x146   : > { %v1383_v17 = vadd.f32 %v1382_v54, %v1354_v25 }
 0x147   : > { %v1703_v24 = vmul.f32 0.7978846, %v1671_v52  ;;  %v1579_v60 = vmul.f32 %v4490_v20, %v4490_v20  ;;  %v3244_v62 = vpop.eup %3243  ;;  %v3202_v52 = vld [vmem:[%s4620_s3 + $0xe0] sm:$0xff] }
 0x148   : > { %v1763_v12 = vadd.f32 1.0, %v3244_v62  ;;  %v3246_v29 = vpop.eup %3245  ;;  %2223 = vmatpush.bf16.msra.mxu3 %v3202_v52 }
 0x149   : > { %3247 = vtanh.f32 %v1703_v24  ;;  %v1611_v4 = vmul.f32 %v1579_v60, %v4490_v20  ;;  %v1790_v23 = vadd.f32 1.0, %v3246_v29 }
 0x14a   : > { %3249 = vtanh.f32 %v1722_v31  ;;  %v1411_v8 = vpop.f32.mrf.mxu2  ;;  %v1795_v53 = vmul.f32 0.5, %v1763_v12 }
 0x14b   : > { %v1643_v30 = vmul.f32 0.044715, %v1611_v4  ;;  %v1412_v55 = vadd.f32 %v1411_v8, %v1383_v17  ;;  %v1440_v19 = vpop.f32.mrf.mxu3  ;;  %v1356_v10 = vpop.f32.mrf.mxu0  ;;  %v1822_v14 = vmul.f32 0.5, %v1790_v23 }
 0x14c   : > { %v1357_v15 = vadd.f32 %v1356_v10, %v4433_v9  ;;  %v1385_v21 = vpop.f32.mrf.mxu1  ;;  %v1827_v32 = vmul.f32 %v1795_v53, %v4462_v5 }
 0x14d   : > { %v1675_v27 = vadd.f32 %v1643_v30, %v4490_v20  ;;  %v4503_v61 = vadd.f32 %v1440_v19, %v1412_v55  ;;  %v1854_v54 = vmul.f32 %v1822_v14, %v4449_v56 }
 0x14e   : > { %2151 = vmatmul.bf16.gmra.mxu0 %v1865_v7  ;;  %v1386_v37 = vadd.f32 %v1385_v21, %v1357_v15  ;;  %2180 = vmatmul.bf16.gmra.mxu1 %v1866_v28 }
 0x14f   : > { %v3248_v0 = vpop.eup %3247  ;;  %v1707_v36 = vmul.f32 0.7978846, %v1675_v27  ;;  %v1583_v16 = vmul.f32 %v4503_v61, %v4503_v61 }
 0x150   : > { %v3250_v33 = vpop.eup %3249  ;;  %v1767_v38 = vadd.f32 1.0, %v3248_v0 }
 0x151   : > { %v1615_v39 = vmul.f32 %v1583_v16, %v4503_v61  ;;  %3251 = vtanh.f32 %v1707_v36  ;;  %v1786_v41 = vadd.f32 1.0, %v3250_v33 }
 0x152   : > { %v1799_v35 = vmul.f32 0.5, %v1767_v38  ;;  %v1414_v63 = vpop.f32.mrf.mxu2  ;;  %v3279_v38 = vld [vmem:[%s4619_s2] sm:$0xf] }
 0x153   : > { %v1647_v3 = vmul.f32 0.044715, %v1615_v39  ;;  %v1415_v7 = vadd.f32 %v1414_v63, %v1386_v37  ;;  %v1443_v40 = vpop.f32.mrf.mxu3  ;;  %v1358_v2 = vpop.f32.mrf.mxu0  ;;  %v1818_v46 = vmul.f32 0.5, %v1786_v41  ;;  %v4549_v39 = vperm.slane %v3279_v38, 3 }
 0x154   : > { %v1831_v50 = vmul.f32 %v1799_v35, %v4476_v34  ;;  %v1387_v51 = vpop.f32.mrf.mxu1  ;;  %v1359_v13 = vadd.f32 %v1358_v2, %v4433_v9 }
 0x155   : > { %v1679_v42 = vadd.f32 %v1647_v3, %v4503_v61  ;;  %v4517_v43 = vadd.f32 %v1443_v40, %v1415_v7  ;;  %v1850_v57 = vmul.f32 %v1818_v46, %v4455_v58  ;;  %v3199_v46 = vld [vmem:[%s4620_s3 + $0xc8] sm:$0xff] }
 0x156   : > { %v1859_v22 = vpack.c.bf16 %v1831_v50, %v1827_v32  ;;  %v1388_v34 = vadd.f32 %v1387_v51, %v1359_v13  ;;  %v3200_v32 = vld [vmem:[%s4620_s3 + $0xd0] sm:$0xff] }
 0x157   : > { %v1711_v44 = vmul.f32 0.7978846, %v1679_v42  ;;  %v1587_v45 = vmul.f32 %v4517_v43, %v4517_v43  ;;  %v3252_v48 = vpop.eup %3251  ;;  %v1870_v56 = vpack.c.bf16 %v1854_v54, %v1850_v57  ;;  %v3198_v57 = vld [vmem:[%s4620_s3 + $0xc0] sm:$0xff] }
 0x158   : > { %2199 = vmatmul.bf16.vlgmr.msra.gmra.mxu2 %v1859_v22  ;;  %v1771_v17 = vadd.f32 1.0, %v3252_v48 }
 0x159   : > { %3253 = vtanh.f32 %v1711_v44  ;;  %v1619_v5 = vmul.f32 %v1587_v45, %v4517_v43 }
 0x15a   : > { %v1416_v25 = vpop.f32.mrf.mxu2  ;;  %v1803_v10 = vmul.f32 0.5, %v1771_v17 }
 0x15b   : > { %v1651_v26 = vmul.f32 0.044715, %v1619_v5  ;;  %v1417_v31 = vadd.f32 %v1416_v25, %v1388_v34  ;;  %v1445_v24 = vpop.f32.mrf.mxu3  ;;  %v1361_v60 = vpop.f32.mrf.mxu0 }
 0x15c   : > { %v1362_v62 = vadd.f32 %v1361_v60, %v4433_v9  ;;  %v1390_v4 = vpop.f32.mrf.mxu1  ;;  %v1835_v49 = vmul.f32 %v1803_v10, %v4490_v20  ;;  %v3201_v20 = vld [vmem:[%s4620_s3 + $0xd8] sm:$0xff] }
 0x15d   : > { %v1683_v18 = vadd.f32 %v1651_v26, %v4517_v43  ;;  %v4530_v6 = vadd.f32 %v1445_v24, %v1417_v31  ;;  %2224 = vmatpush.bf16.msra.mxu3 %v3201_v20 }
 0x15e   : > { %2156 = vmatmul.bf16.gmra.mxu0 %v1869_v59  ;;  %v1391_v58 = vadd.f32 %v1390_v4, %v1362_v62  ;;  %2185 = vmatmul.bf16.gmra.mxu1 %v1870_v56 }
 0x15f   : > { %v3254_v8 = vpop.eup %3253  ;;  %v1715_v30 = vmul.f32 0.7978846, %v1683_v18  ;;  %v1591_v55 = vmul.f32 %v4530_v6, %v4530_v6 }
 0x160   : > { %v1775_v19 = vadd.f32 1.0, %v3254_v8 }
 0x161   : > { %v1623_v11 = vmul.f32 %v1591_v55, %v4530_v6  ;;  %3255 = vtanh.f32 %v1715_v30  ;;  %2225 = vmatpush.bf16.msra.mxu3 %v3200_v32 }
 0x162   : > { %v1419_v12 = vpop.f32.mrf.mxu2  ;;  %v1807_v15 = vmul.f32 0.5, %v1775_v19 }
 0x163   : > { %v1655_v21 = vmul.f32 0.044715, %v1623_v11  ;;  %v1420_v27 = vadd.f32 %v1419_v12, %v1391_v58  ;;  %v1448_v28 = vpop.f32.mrf.mxu3  ;;  %v1363_v29 = vpop.f32.mrf.mxu0 }
 0x164   : > { %v1392_v47 = vpop.f32.mrf.mxu1  ;;  %v1839_v59 = vmul.f32 %v1807_v15, %v4503_v61  ;;  %v1364_v16 = vadd.f32 %v1363_v29, %v4433_v9 }
 0x165   : > { %v1687_v0 = vadd.f32 %v1655_v21, %v4530_v6  ;;  %v4541_v36 = vadd.f32 %v1448_v28, %v1420_v27  ;;  %2226 = vmatpush.bf16.msra.mxu3 %v3199_v46 }
 0x166   : > { %v1863_v37 = vpack.c.bf16 %v1839_v59, %v1835_v49  ;;  %v1393_v23 = vadd.f32 %v1392_v47, %v1364_v16 }
 0x167   : > { %v1719_v33 = vmul.f32 0.7978846, %v1687_v0  ;;  %v1595_v53 = vmul.f32 %v4541_v36, %v4541_v36  ;;  %v3256_v61 = vpop.eup %3255 }
 0x168   : > { %2204 = vmatmul.bf16.gmra.mxu2 %v1863_v37  ;;  %v1779_v41 = vadd.f32 1.0, %v3256_v61 }
 0x169   : > { %3257 = vtanh.f32 %v1719_v33  ;;  %v1627_v9 = vmul.f32 %v1595_v53, %v4541_v36  ;;  %2227 = vmatpush.bf16.msra.mxu3 %v3198_v57 }
 0x16a   : > { %v1421_v1 = vpop.f32.mrf.mxu2  ;;  %v1811_v45 = vmul.f32 0.5, %v1779_v41 }
 0x16b   : > { %v1659_v35 = vmul.f32 0.044715, %v1627_v9  ;;  %v1422_v63 = vadd.f32 %v1421_v1, %v1393_v23  ;;  %v1450_v3 = vpop.f32.mrf.mxu3  ;;  %v1462_v7 = vpop.f32.mrf.mxu0 }
 0x16c   : > { %v1463_v40 = vadd.f32 %v1462_v7, %v4549_v39  ;;  %v1491_v2 = vpop.f32.mrf.mxu1  ;;  %v1843_v24 = vmul.f32 %v1811_v45, %v4517_v43 }
 0x16d   : > { %v1691_v50 = vadd.f32 %v1659_v35, %v4541_v36  ;;  %v1451_v51 = vadd.f32 %v1450_v3, %v1422_v63 }
 0x16e   : > { %v1492_v22 = vadd.f32 %v1491_v2, %v1463_v40 }
 0x16f   : > { %v3258_v42 = vpop.eup %3257  ;;  %v1723_v13 = vmul.f32 0.7978846, %v1691_v50  ;;  %v1599_v14 = vmul.f32 %v1451_v51, %v1451_v51 }
 0x170   : > { %v1783_v44 = vadd.f32 1.0, %v3258_v42 }
 0x171   : > { %v1631_v48 = vmul.f32 %v1599_v14, %v1451_v51  ;;  %3259 = vtanh.f32 %v1723_v13 }
 0x172   : > { %v1520_v5 = vpop.f32.mrf.mxu2  ;;  %v1815_v34 = vmul.f32 0.5, %v1783_v44 }
 0x173   : > { %v1663_v54 = vmul.f32 0.044715, %v1631_v48  ;;  %v1521_v52 = vadd.f32 %v1520_v5, %v1492_v22  ;;  %v1549_v25 = vpop.f32.mrf.mxu3  ;;  %v1464_v26 = vpop.f32.mrf.mxu0 }
 0x174   : > { %v1493_v31 = vpop.f32.mrf.mxu1  ;;  %v1847_v60 = vmul.f32 %v1815_v34, %v4530_v6  ;;  %v1465_v17 = vadd.f32 %v1464_v26, %v4549_v39 }
 0x175   : > { %v1695_v62 = vadd.f32 %v1663_v54, %v1451_v51  ;;  %v4568_v4 = vadd.f32 %v1549_v25, %v1521_v52 }
 0x176   : > { %v1867_v18 = vpack.c.bf16 %v1847_v60, %v1843_v24  ;;  %v1494_v6 = vadd.f32 %v1493_v31, %v1465_v17 }
 0x177   : > { %v1727_v56 = vmul.f32 0.7978846, %v1695_v62  ;;  %v1572_v8 = vmul.f32 %v4568_v4, %v4568_v4  ;;  %v3260_v30 = vpop.eup %3259 }
 0x178   : > { %2209 = vmatmul.bf16.gmra.mxu2 %v1867_v18  ;;  %v1787_v21 = vadd.f32 1.0, %v3260_v30 }
 0x179   : > { %3261 = vtanh.f32 %v1727_v56  ;;  %v1604_v43 = vmul.f32 %v1572_v8, %v4568_v4 }
 0x17a   : > { %v1522_v55 = vpop.f32.mrf.mxu2  ;;  %v1819_v16 = vmul.f32 0.5, %v1787_v21 }
 0x17b   : > { %v1636_v58 = vmul.f32 0.044715, %v1604_v43  ;;  %v1523_v19 = vadd.f32 %v1522_v55, %v1494_v6  ;;  %v1551_v10 = vpop.f32.mrf.mxu3  ;;  %v1467_v11 = vpop.f32.mrf.mxu0 }
 0x17c   : > { %v1468_v12 = vadd.f32 %v1467_v11, %v4549_v39  ;;  %v1496_v15 = vpop.f32.mrf.mxu1  ;;  %v1851_v1 = vmul.f32 %v1819_v16, %v4541_v36 }
 0x17d   : > { %v1668_v27 = vadd.f32 %v1636_v58, %v4568_v4  ;;  %v1552_v28 = vadd.f32 %v1551_v10, %v1523_v19 }
 0x17e   : > { %v1497_v59 = vadd.f32 %v1496_v15, %v1468_v12 }
 0x17f   : > { %v3262_v29 = vpop.eup %3261  ;;  %v1700_v47 = vmul.f32 0.7978846, %v1668_v27  ;;  %v1576_v49 = vmul.f32 %v1552_v28, %v1552_v28 }
 0x180   : > { %v1791_v0 = vadd.f32 1.0, %v3262_v29 }
 0x181   : > { %v1608_v37 = vmul.f32 %v1576_v49, %v1552_v28  ;;  %3263 = vtanh.f32 %v1700_v47 }
 0x182   : > { %v1525_v33 = vpop.f32.mrf.mxu2  ;;  %v1823_v53 = vmul.f32 0.5, %v1791_v0 }
 0x183   : > { %v1640_v38 = vmul.f32 0.044715, %v1608_v37  ;;  %v1526_v20 = vadd.f32 %v1525_v33, %v1497_v59  ;;  %v1554_v61 = vpop.f32.mrf.mxu3  ;;  %v1469_v9 = vpop.f32.mrf.mxu0 }
 0x184   : > { %v1498_v23 = vpop.f32.mrf.mxu1  ;;  %v1855_v35 = vmul.f32 %v1823_v53, %v1451_v51  ;;  %v1470_v7 = vadd.f32 %v1469_v9, %v4549_v39 }
 0x185   : > { %v1672_v63 = vadd.f32 %v1640_v38, %v1552_v28  ;;  %v4577_v3 = vadd.f32 %v1554_v61, %v1526_v20 }
 0x186   : > { %v1871_v40 = vpack.c.bf16 %v1855_v35, %v1851_v1  ;;  %v1499_v42 = vadd.f32 %v1498_v23, %v1470_v7 }
 0x187   : > { %v1704_v2 = vmul.f32 0.7978846, %v1672_v63  ;;  %v1580_v41 = vmul.f32 %v4577_v3, %v4577_v3  ;;  %v3264_v32 = vpop.eup %3263 }
 0x188   : > { %2214 = vmatmul.bf16.gmra.mxu2 %v1871_v40  ;;  %v1764_v44 = vadd.f32 1.0, %v3264_v32 }
 0x189   : > { %3265 = vtanh.f32 %v1704_v2  ;;  %v1612_v50 = vmul.f32 %v1580_v41, %v4577_v3 }
 0x18a   : > { %v1527_v13 = vpop.f32.mrf.mxu2  ;;  %v1796_v26 = vmul.f32 0.5, %v1764_v44 }
 0x18b   : > { %v1644_v14 = vmul.f32 0.044715, %v1612_v50  ;;  %v1528_v36 = vadd.f32 %v1527_v13, %v1499_v42  ;;  %v1556_v51 = vpop.f32.mrf.mxu3  ;;  %v1472_v22 = vpop.f32.mrf.mxu0 }
 0x18c   : > { %v1473_v45 = vadd.f32 %v1472_v22, %v4549_v39  ;;  %v1501_v46 = vpop.f32.mrf.mxu1  ;;  %v1828_v8 = vmul.f32 %v1796_v26, %v4568_v4 }
 0x18d   : > { %v1676_v48 = vadd.f32 %v1644_v14, %v4577_v3  ;;  %v1557_v5 = vadd.f32 %v1556_v51, %v1528_v36 }
 0x18e   : > { %v1502_v25 = vadd.f32 %v1501_v46, %v1473_v45 }
 0x18f   : > { %v3266_v34 = vpop.eup %3265  ;;  %v1708_v54 = vmul.f32 0.7978846, %v1676_v48  ;;  %v1584_v52 = vmul.f32 %v1557_v5, %v1557_v5 }
 0x190   : > { %v1768_v31 = vadd.f32 1.0, %v3266_v34 }
 0x191   : > { %v1616_v24 = vmul.f32 %v1584_v52, %v1557_v5  ;;  %3267 = vtanh.f32 %v1708_v54 }
 0x192   : > { %v1800_v60 = vmul.f32 0.5, %v1768_v31  ;;  %v1530_v57 = vpop.f32.mrf.mxu2 }
 0x193   : > { %v1648_v62 = vmul.f32 0.044715, %v1616_v24  ;;  %v1531_v17 = vadd.f32 %v1530_v57, %v1502_v25  ;;  %v1559_v18 = vpop.f32.mrf.mxu3  ;;  %v1474_v56 = vpop.f32.mrf.mxu0 }
 0x194   : > { %v1832_v30 = vmul.f32 %v1800_v60, %v1552_v28  ;;  %v1503_v43 = vpop.f32.mrf.mxu1  ;;  %v1475_v58 = vadd.f32 %v1474_v56, %v4549_v39 }
 0x195   : > { %v1680_v6 = vadd.f32 %v1648_v62, %v1557_v5  ;;  %v4586_v55 = vadd.f32 %v1559_v18, %v1531_v17 }
 0x196   : > { %v1860_v19 = vpack.c.bf16 %v1832_v30, %v1828_v8  ;;  %v1504_v21 = vadd.f32 %v1503_v43, %v1475_v58 }
 0x197   : > { %v1712_v10 = vmul.f32 0.7978846, %v1680_v6  ;;  %v1588_v11 = vmul.f32 %v4586_v55, %v4586_v55  ;;  %v3268_v12 = vpop.eup %3267 }
 0x198   : > { %2228 = vmatmul.bf16.vlgmr.msra.gmra.mxu3 %v1860_v19  ;;  %v1772_v59 = vadd.f32 1.0, %v3268_v12 }
 0x199   : > { %3269 = vtanh.f32 %v1712_v10  ;;  %v1620_v15 = vmul.f32 %v1588_v11, %v4586_v55 }
 0x19a   : > { %v1532_v27 = vpop.f32.mrf.mxu2  ;;  %v1804_v9 = vmul.f32 0.5, %v1772_v59 }
 0x19b   : > { %v1652_v4 = vmul.f32 0.044715, %v1620_v15  ;;  %v1533_v28 = vadd.f32 %v1532_v27, %v1504_v21  ;;  %v1561_v29 = vpop.f32.mrf.mxu3  ;;  %v1477_v47 = vpop.f32.mrf.mxu0 }
 0x19c   : > { %v1478_v49 = vadd.f32 %v1477_v47, %v4549_v39  ;;  %v1506_v37 = vpop.f32.mrf.mxu1  ;;  %v1836_v41 = vmul.f32 %v1804_v9, %v4577_v3  ;;  %v3214_v47 = vld [vmem:[%s4621_s4] ss:$0 sm:$0xff] }
 0x19d   : > { %v1684_v0 = vadd.f32 %v1652_v4, %v4586_v55  ;;  %v1562_v16 = vadd.f32 %v1561_v29, %v1533_v28 }
 0x19e   : > { %v1507_v20 = vadd.f32 %v1506_v37, %v1478_v49 }
 0x19f   : > { %v3270_v33 = vpop.eup %3269  ;;  %v1716_v53 = vmul.f32 0.7978846, %v1684_v0  ;;  %v1592_v38 = vmul.f32 %v1562_v16, %v1562_v16 }
 0x1a0   : > { %v1776_v61 = vadd.f32 1.0, %v3270_v33 }
 0x1a1   : > { %v1624_v23 = vmul.f32 %v1592_v38, %v1562_v16  ;;  %3271 = vtanh.f32 %v1716_v53 }
 0x1a2   : > { %v1535_v1 = vpop.f32.mrf.mxu2  ;;  %v1808_v35 = vmul.f32 0.5, %v1776_v61 }
 0x1a3   : > { %v1656_v63 = vmul.f32 0.044715, %v1624_v23  ;;  %v1536_v7 = vadd.f32 %v1535_v1, %v1507_v20  ;;  %v1564_v40 = vpop.f32.mrf.mxu3  ;;  %v1479_v2 = vpop.f32.mrf.mxu0 }
 0x1a4   : > { %v1840_v32 = vmul.f32 %v1808_v35, %v1557_v5  ;;  %v1480_v13 = vadd.f32 %v1479_v2, %v4549_v39  ;;  %v1508_v22 = vpop.f32.mrf.mxu1 }
 0x1a5   : > { %v1688_v50 = vadd.f32 %v1656_v63, %v1562_v16  ;;  %v1565_v42 = vadd.f32 %v1564_v40, %v1536_v7 }
 0x1a6   : > { %v1864_v14 = vpack.c.bf16 %v1840_v32, %v1836_v41  ;;  %v1509_v46 = vadd.f32 %v1508_v22, %v1480_v13 }
 0x1a7   : > { %v1720_v36 = vmul.f32 0.7978846, %v1688_v50  ;;  %v1596_v51 = vmul.f32 %v1565_v42, %v1565_v42  ;;  %v3272_v44 = vpop.eup %3271 }
 0x1a8   : > { %2233 = vmatmul.bf16.gmra.mxu3 %v1864_v14  ;;  %v1780_v25 = vadd.f32 1.0, %v3272_v44 }
 0x1a9   : > { %3273 = vtanh.f32 %v1720_v36  ;;  %v1628_v45 = vmul.f32 %v1596_v51, %v1565_v42 }
 0x1aa   : > { %v1537_v48 = vpop.f32.mrf.mxu2  ;;  %v1812_v60 = vmul.f32 0.5, %v1780_v25 }
 0x1ab   : > { %v1660_v34 = vmul.f32 0.044715, %v1628_v45  ;;  %v1538_v54 = vadd.f32 %v1537_v48, %v1509_v46  ;;  %v1566_v52 = vpop.f32.mrf.mxu3  ;;  %v2142_v4 = vpop.f32.mrf.mxu0 }
 0x1ac   : > { %v1844_v18 = vmul.f32 %v1812_v60, %v4586_v55  ;;  %v2171_v28 = vpop.f32.mrf.mxu1  ;;  %v2143_v0 = vadd.f32 %v3214_v47, %v2142_v4 }
 0x1ad   : > { %v1692_v3 = vadd.f32 %v1660_v34, %v1565_v42  ;;  %v1567_v5 = vadd.f32 %v1566_v52, %v1538_v54 }
 0x1ae   : > { %v2172_v37 = vadd.f32 %v2171_v28, %v2143_v0 }
 0x1af   : > { %v3274_v26 = vpop.eup %3273  ;;  %v1724_v31 = vmul.f32 0.7978846, %v1692_v3  ;;  %v1600_v24 = vmul.f32 %v1567_v5, %v1567_v5 }
 0x1b0   : > { %v1784_v39 = vadd.f32 1.0, %v3274_v26 }
 0x1b1   : > { %v1632_v57 = vmul.f32 %v1600_v24, %v1567_v5  ;;  %3275 = vtanh.f32 %v1724_v31 }
 0x1b2   : > { %v1816_v62 = vmul.f32 0.5, %v1784_v39 }
 0x1b3   : > { %v1664_v17 = vmul.f32 0.044715, %v1632_v57  ;;  %v2144_v29 = vpop.f32.mrf.mxu0 }
 0x1b4   : > { %v1848_v56 = vmul.f32 %v1816_v62, %v1562_v16  ;;  %v2173_v49 = vpop.f32.mrf.mxu1  ;;  %v2145_v38 = vadd.f32 %v3214_v47, %v2144_v29 }
 0x1b5   : > { %v1696_v8 = vadd.f32 %v1664_v17, %v1567_v5 }
 0x1b6   : > { %v1868_v30 = vpack.c.bf16 %v1848_v56, %v1844_v18  ;;  %v2174_v23 = vadd.f32 %v2173_v49, %v2145_v38 }
 0x1b7   : > { %v1728_v43 = vmul.f32 0.7978846, %v1696_v8  ;;  %v3276_v6 = vpop.eup %3275 }
 0x1b8   : > { %2238 = vmatmul.bf16.gmra.mxu3 %v1868_v30  ;;  %v1788_v58 = vadd.f32 1.0, %v3276_v6 }
 0x1b9   : > { %3277 = vtanh.f32 %v1728_v43 }
 0x1ba   : > { %v1820_v11 = vmul.f32 0.5, %v1788_v58 }
 0x1bb   : > { %v2147_v16 = vpop.f32.mrf.mxu0 }
 0x1bc   : > { %v1852_v15 = vmul.f32 %v1820_v11, %v1565_v42  ;;  %v2176_v20 = vpop.f32.mrf.mxu1  ;;  %v2148_v7 = vadd.f32 %v3214_v47, %v2147_v16 }
 0x1be   : > { %v2177_v32 = vadd.f32 %v2176_v20, %v2148_v7 }
 0x1bf   : > { %v3278_v19 = vpop.eup %3277 }
 0x1c0   : > { %v1792_v10 = vadd.f32 1.0, %v3278_v19 }
 0x1c2   : > { %v1824_v12 = vmul.f32 0.5, %v1792_v10 }
 0x1c3   : > { %v2149_v1 = vpop.f32.mrf.mxu0 }
 0x1c4   : > { %v1856_v21 = vmul.f32 %v1824_v12, %v1567_v5  ;;  %v2178_v2 = vpop.f32.mrf.mxu1  ;;  %v2150_v14 = vadd.f32 %v3214_v47, %v2149_v1 }
 0x1c6   : > { %v1872_v27 = vpack.c.bf16 %v1856_v21, %v1852_v15  ;;  %v2179_v51 = vadd.f32 %v2178_v2, %v2150_v14 }
 0x1c8   : > { %2243 = vmatmul.bf16.gmra.mxu3 %v1872_v27 }
 0x1cb   : > { %v2152_v42 = vpop.f32.mrf.mxu0 }
 0x1cc   : > { %v2181_v22 = vpop.f32.mrf.mxu1  ;;  %v2153_v48 = vadd.f32 %v3214_v47, %v2152_v42 }
 0x1ce   : > { %v2182_v52 = vadd.f32 %v2181_v22, %v2153_v48 }
 0x1d3   : > { %v2154_v54 = vpop.f32.mrf.mxu0 }
 0x1d4   : > { %v2183_v25 = vpop.f32.mrf.mxu1  ;;  %v2155_v31 = vadd.f32 %v3214_v47, %v2154_v54 }
 0x1d6   : > { %v2184_v60 = vadd.f32 %v2183_v25, %v2155_v31 }
 0x1db   : > { %v2200_v55 = vpop.f32.mrf.mxu2  ;;  %v2157_v39 = vpop.f32.mrf.mxu0 }
 0x1dc   : > { %v2201_v33 = vadd.f32 %v2200_v55, %v2172_v37  ;;  %v2158_v17 = vadd.f32 %v3214_v47, %v2157_v39  ;;  %v2186_v56 = vpop.f32.mrf.mxu1 }
 0x1de   : > { %v2187_v30 = vadd.f32 %v2186_v56, %v2158_v17 }
 0x1e3   : > { %v2202_v59 = vpop.f32.mrf.mxu2  ;;  %v2159_v43 = vpop.f32.mrf.mxu0 }
 0x1e4   : > { %v2203_v35 = vadd.f32 %v2202_v59, %v2174_v23  ;;  %v2160_v19 = vadd.f32 %v3214_v47, %v2159_v43  ;;  %v2188_v11 = vpop.f32.mrf.mxu1 }
 0x1e6   : > { %v2189_v15 = vadd.f32 %v2188_v11, %v2160_v19 }
 0x1eb   : > { %v2205_v9 = vpop.f32.mrf.mxu2 }
 0x1ec   : > { %v2206_v50 = vadd.f32 %v2205_v9, %v2177_v32 }
 0x1f3   : > { %v2207_v41 = vpop.f32.mrf.mxu2 }
 0x1f4   : > { %v2208_v45 = vadd.f32 %v2207_v41, %v2179_v51 }
 0x1fb   : > { %v2210_v44 = vpop.f32.mrf.mxu2 }
 0x1fc   : > { %v2211_v3 = vadd.f32 %v2210_v44, %v2182_v52 }
 0x203   : > { %v2212_v5 = vpop.f32.mrf.mxu2 }
 0x204   : > { %v2213_v57 = vadd.f32 %v2212_v5, %v2184_v60 }
 0x20b   : > { %v2215_v8 = vpop.f32.mrf.mxu2 }
 0x20c   : > { %v2216_v6 = vadd.f32 %v2215_v8, %v2187_v30 }
 0x213   : > { %v2217_v12 = vpop.f32.mrf.mxu2 }
 0x214   : > { %v2218_v21 = vadd.f32 %v2217_v12, %v2189_v15 }
 0x21b   : > { %v2229_v53 = vpop.f32.mrf.mxu3 }
 0x21c   : > { %v2230_v61 = vadd.f32 %v2229_v53, %v2201_v33 }
 0x21e   : > { %2249 = vst [vmem:[%s4604_s17] sm:$0xff] %v2230_v61 }
 0x223   : > { %v2231_v63 = vpop.f32.mrf.mxu3 }
 0x224   : > { %v2232_v40 = vadd.f32 %v2231_v63, %v2203_v35 }
 0x226   : > { %2250 = vst [vmem:[%s4604_s17 + $0x8] sm:$0xff] %v2232_v40 }
 0x22b   : > { %v2234_v13 = vpop.f32.mrf.mxu3 }
 0x22c   : > { %v2235_v36 = vadd.f32 %v2234_v13, %v2206_v50 }
 0x22e   : > { %2251 = vst [vmem:[%s4604_s17 + $0x10] sm:$0xff] %v2235_v36 }
 0x233   : > { %v2236_v46 = vpop.f32.mrf.mxu3 }
 0x234   : > { %v2237_v34 = vadd.f32 %v2236_v46, %v2208_v45 }
 0x236   : > { %2252 = vst [vmem:[%s4604_s17 + $0x18] sm:$0xff] %v2237_v34 }
 0x23b   : > { %v2239_v26 = vpop.f32.mrf.mxu3 }
 0x23c   : > { %v2240_v24 = vadd.f32 %v2239_v26, %v2211_v3 }
 0x23e   : > { %2253 = vst [vmem:[%s4604_s17 + $0x20] sm:$0xff] %v2240_v24 }
 0x243   : > { %v2241_v62 = vpop.f32.mrf.mxu3 }
 0x244   : > { %v2242_v18 = vadd.f32 %v2241_v62, %v2213_v57 }
 0x246   : > { %2254 = vst [vmem:[%s4604_s17 + $0x28] sm:$0xff] %v2242_v18 }
 0x24b   : > { %v2244_v58 = vpop.f32.mrf.mxu3 }
 0x24c   : > { %v2245_v10 = vadd.f32 %v2244_v58, %v2216_v6 }
 0x24e   : > { %2255 = vst [vmem:[%s4604_s17 + $0x30] sm:$0xff] %v2245_v10 }
 0x253   : > { %v2246_v27 = vpop.f32.mrf.mxu3 }
 0x254   : > { %v2247_v4 = vadd.f32 %v2246_v27, %v2218_v21 }
 0x256   : > { %2256 = vst [vmem:[%s4604_s17 + $0x38] sm:$0xff] %v2247_v4 }
 0x257 PF: > { %s15_s18 = sadd.s32 1, %s3286_s18  }
 0x258   : > { %p12_p4 = scmp.ge.s32.totalorder %s15_s18, 4  }
 0x25a   :  { %14 = sbr.rel (!%p12_p4) target bundleno = 1 (0x1), region = 70 }

</bundles_post_ra>
